<compile_context>
chip_gen: v6e
topology: v6e:2x2x1
jax: 0.10.0
libtpu: 0.0.40
codegen_flags: <defaults>
</compile_context>

<pallas_src>
import jax
import jax.numpy as jnp
from jax import lax
from jax.experimental import pallas as pl
from jax.experimental.pallas import tpu as pltpu

_F32_SUBLANE = 8
_BF16_SUBLANE = 16
_TILE_ROWS_CAP = 512           # sweep 256/512/1024 at production batch sizes
# 32 MiB is under the scoped default on v5e/v6e and well under v7x's 64 MiB.
_VMEM_LIMIT = 32 * 1024 * 1024


def _round_up(x, m):
    return ((x + m - 1) // m) * m


def _conv_out(size, k, s):
    return (size - k) // s + 1


def _pick_row_tile(m, align, cap):
    """Row tile + padded row count.  Prefers a >=2-step grid (v7x has two
    TensorCores) once there are at least two aligned tiles worth of rows."""
    if m < 2 * align:
        return m, m                       # single full-extent block, no pad
    m_aligned = _round_up(m, align)
    half = _round_up((m_aligned + 1) // 2, align)
    tm = min(cap, half)
    return tm, _round_up(m_aligned, tm)


def _assert_vmem(tag, nbytes):
    assert nbytes <= _VMEM_LIMIT, (
        f"{tag}: estimated VMEM use {nbytes} bytes exceeds {_VMEM_LIMIT}")


# ----------------------------------------------------------------------------
# Kernel 1: conv1 as GEMM with a lane-dense [rows=(n,oh), cols=(ow,oc)] output.
# Input rows carry all OW patches side by side, so the kernel runs one GEMM
# per OW strip and writes the strips into adjacent 32-lane column slots of the
# 256-lane output block (dense HBM writeback, no reshape needed).
# ----------------------------------------------------------------------------
def _conv1_kernel(x_ref, w_ref, b_ref, o_ref):
    kpatch, oc = w_ref.shape
    n_strips = x_ref.shape[1] // kpatch
    w = w_ref[...]
    b = b_ref[...]
    for s in range(n_strips):                       # static unroll (OW = 8)
        xs = x_ref[:, s * kpatch:(s + 1) * kpatch].astype(w.dtype)
        acc = jnp.dot(xs, w, preferred_element_type=jnp.float32)
        o_ref[:, s * oc:(s + 1) * oc] = jnp.maximum(acc + b, 0.0).astype(o_ref.dtype)


def conv1_lane_dense(x_nhwc, w_mat, b, kh, kw, stride, *, row_cap=_TILE_ROWS_CAP):
    """First conv (k8 s4) via XLA im2col + Pallas GEMM.  Returns NHWC f32."""
    n, hh, ww, c = x_nhwc.shape
    oh, ow = _conv_out(hh, kh, stride), _conv_out(ww, kw, stride)
    kpatch = kh * kw * c
    oc = w_mat.shape[1]

    # XLA im2col (patch vector in (KH, KW, C) order matching the weight rows);
    # rows = (n, oh), columns = (ow, patch).
    cols = []
    for i in range(kh):
        for j in range(kw):
            cols.append(x_nhwc[:, i:i + stride * oh:stride,
                               j:j + stride * ow:stride, :])
    p = jnp.stack(cols, axis=3)                     # [N, OH, OW, KH*KW, C]
    p = p.reshape(n * oh, ow * kpatch).astype(jnp.float32)

    m = n * oh
    tm, m_pad = _pick_row_tile(m, _F32_SUBLANE, row_cap)
    if m_pad != m:
        p = jnp.pad(p, ((0, m_pad - m), (0, 0)))

    b2d = b.reshape(1, oc).astype(jnp.float32)
    w_bf = w_mat.astype(jnp.bfloat16)

    flops = 2 * m_pad * ow * kpatch * oc
    bytes_accessed = int(m_pad * ow * kpatch * 4 + kpatch * oc * 2 + oc * 4
                         + m_pad * ow * oc * 4)
    _assert_vmem("conv1",
                 2 * (tm * ow * kpatch * 4 + tm * ow * oc * 4)
                 + 2 * (kpatch * oc * 2 + oc * 4))

    out = pl.pallas_call(
        _conv1_kernel,
        out_shape=jax.ShapeDtypeStruct((m_pad, ow * oc), jnp.float32),
        grid=(m_pad // tm,),
        in_specs=[
            pl.BlockSpec((tm, ow * kpatch), lambda i: (i, 0)),
            pl.BlockSpec((kpatch, oc), lambda i: (0, 0)),   # weights resident
            pl.BlockSpec((1, oc), lambda i: (0, 0)),
        ],
        out_specs=pl.BlockSpec((tm, ow * oc), lambda i: (i, 0)),
        compiler_params=pltpu.CompilerParams(
            dimension_semantics=("parallel",),
            vmem_limit_bytes=_VMEM_LIMIT),
        cost_estimate=pl.CostEstimate(
            flops=flops, transcendentals=0, bytes_accessed=bytes_accessed),
    )(p, w_bf, b2d)
    return out[:m].reshape(n, oh, ow, oc)


# ----------------------------------------------------------------------------
# Kernel 2: fused conv2 + conv3 + fc1 + fc2.
# x2_ref holds conv2's im2col patches position-major [9, tb, 512]; each
# position's conv2 GEMM result is folded straight into conv3's accumulator
# (conv3 output is 1x1 spatially), then fc1 (+ReLU) and fc2 run on the
# VMEM-resident activations.  fc2's output is a full 128-lane slab.
# ----------------------------------------------------------------------------
def _tail_kernel(x2_ref, w2_ref, b2_ref, w3_ref, b3_ref,
                 wf1_ref, bf1_ref, wf2_ref, bf2_ref, o_ref):
    npos, tb, _ = x2_ref.shape
    oc2 = w2_ref.shape[1]
    w2 = w2_ref[...]
    b2 = b2_ref[...]
    acc3 = jnp.zeros((tb, w3_ref.shape[1]), jnp.float32)
    for p in range(npos):                            # static unroll (3x3 = 9)
        h2 = jnp.dot(x2_ref[p], w2, preferred_element_type=jnp.float32)
        h2 = jnp.maximum(h2 + b2, 0.0)               # conv2 + ReLU (one position)
        acc3 = acc3 + jnp.dot(h2.astype(w3_ref.dtype),
                              w3_ref[p * oc2:(p + 1) * oc2, :],
                              preferred_element_type=jnp.float32)
    h3 = jnp.maximum(acc3 + b3_ref[...], 0.0)        # conv3 + ReLU (1x1 spatial)
    h4 = jnp.dot(h3.astype(wf1_ref.dtype), wf1_ref[...],
                 preferred_element_type=jnp.float32)
    h4 = jnp.maximum(h4 + bf1_ref[...], 0.0)         # fc1 + ReLU
    q = jnp.dot(h4.astype(wf2_ref.dtype), wf2_ref[...],
                preferred_element_type=jnp.float32)
    o_ref[...] = (q + bf2_ref[...]).astype(o_ref.dtype)   # fc2 (lane-padded)


def conv_tail_fused(h1_nhwc, params, n_actions, *, row_cap=_TILE_ROWS_CAP):
    """conv2(k4 s2) + conv3(k3 s1) + fc1 + fc2 in one pallas_call.

    Requires conv3's output to be spatially 1x1 (true for the 36x36 input used
    here), so conv2's flattened output is exactly conv3's patch matrix."""
    n, h1s, w1s, c1 = h1_nhwc.shape
    kh2, kw2, s2 = 4, 4, 2
    oh2, ow2 = _conv_out(h1s, kh2, s2), _conv_out(w1s, kw2, s2)
    assert oh2 == 3 and ow2 == 3, "fused tail assumes conv3's output is 1x1"
    npos = oh2 * ow2
    k2 = kh2 * kw2 * c1

    w2 = params["c2w"]
    w3 = params["c3w"]
    wf1, wf2 = params["f1w"], params["f2w"]
    assert w3.shape[0] == npos * w2.shape[1]
    b2 = params["c2b"].reshape(1, -1).astype(jnp.float32)
    b3 = params["c3b"].reshape(1, -1).astype(jnp.float32)
    bf1 = params["f1b"].reshape(1, -1).astype(jnp.float32)
    bf2 = params["f2b"].reshape(1, -1).astype(jnp.float32)
    np_out = wf2.shape[1]

    # XLA im2col for conv2, position-major so no in-kernel reshape is needed.
    cols = []
    for i in range(kh2):
        for j in range(kw2):
            cols.append(h1_nhwc[:, i:i + s2 * oh2:s2, j:j + s2 * ow2:s2, :])
    p2 = jnp.stack(cols, axis=3)                     # [N, 3, 3, KH*KW, C]
    p2 = p2.reshape(n, npos, k2).transpose(1, 0, 2)  # [9, N, 512]
    p2 = p2.astype(jnp.bfloat16)

    tb, n_pad = _pick_row_tile(n, _BF16_SUBLANE, row_cap)
    if n_pad != n:
        p2 = jnp.pad(p2, ((0, 0), (0, n_pad - n), (0, 0)))

    weight_bytes = (w2.size + w3.size + wf1.size + wf2.size) * 2 \
        + (b2.size + b3.size + bf1.size + bf2.size) * 4
    flops = 2 * n_pad * (npos * k2 * w2.shape[1]
                         + npos * w2.shape[1] * w3.shape[1]
                         + wf1.shape[0] * wf1.shape[1]
                         + wf2.shape[0] * np_out)
    bytes_accessed = int(npos * n_pad * k2 * 2 + weight_bytes + n_pad * np_out * 4)
    _assert_vmem("tail",
                 2 * (npos * tb * k2 * 2 + tb * np_out * 4) + 2 * weight_bytes)

    out = pl.pallas_call(
        _tail_kernel,
        out_shape=jax.ShapeDtypeStruct((n_pad, np_out), jnp.float32),
        grid=(n_pad // tb,),
        in_specs=[
            pl.BlockSpec((npos, tb, k2), lambda i: (0, i, 0)),
            pl.BlockSpec(w2.shape, lambda i: (0, 0)),        # weights resident
            pl.BlockSpec(b2.shape, lambda i: (0, 0)),
            pl.BlockSpec(w3.shape, lambda i: (0, 0)),
            pl.BlockSpec(b3.shape, lambda i: (0, 0)),
            pl.BlockSpec(wf1.shape, lambda i: (0, 0)),
            pl.BlockSpec(bf1.shape, lambda i: (0, 0)),
            pl.BlockSpec(wf2.shape, lambda i: (0, 0)),
            pl.BlockSpec(bf2.shape, lambda i: (0, 0)),
        ],
        out_specs=pl.BlockSpec((tb, np_out), lambda i: (i, 0)),
        compiler_params=pltpu.CompilerParams(
            dimension_semantics=("parallel",),
            vmem_limit_bytes=_VMEM_LIMIT),
        cost_estimate=pl.CostEstimate(
            flops=flops, transcendentals=0, bytes_accessed=bytes_accessed),
    )(p2, w2, b2, w3, b3, wf1, bf1, wf2, bf2)
    return out[:n, :n_actions]


# ----------------------------------------------------------------------------
# Parameters: PyTorch-layout init + conversion to kernel-friendly layout.
# ----------------------------------------------------------------------------
def init_dqn_params(key, input_shape, n_actions):
    """Parameters in PyTorch layout: conv [OC, C, KH, KW]; linear [out, in]."""
    c_in, hh, ww = input_shape
    h1, w1 = _conv_out(hh, 8, 4), _conv_out(ww, 8, 4)
    h2, w2 = _conv_out(h1, 4, 2), _conv_out(w1, 4, 2)
    h3, w3 = _conv_out(h2, 3, 1), _conv_out(w2, 3, 1)
    conv_out_size = 64 * h3 * w3

    def uniform(k, shape, fan_in):
        bound = 1.0 / jnp.sqrt(jnp.float32(fan_in))
        return jax.random.uniform(k, shape, jnp.float32, -bound, bound)

    ks = jax.random.split(key, 10)
    return {
        "c1w": uniform(ks[0], (32, c_in, 8, 8), c_in * 8 * 8),
        "c1b": uniform(ks[1], (32,), c_in * 8 * 8),
        "c2w": uniform(ks[2], (64, 32, 4, 4), 32 * 4 * 4),
        "c2b": uniform(ks[3], (64,), 32 * 4 * 4),
        "c3w": uniform(ks[4], (64, 64, 3, 3), 64 * 3 * 3),
        "c3b": uniform(ks[5], (64,), 64 * 3 * 3),
        "f1w": uniform(ks[6], (512, conv_out_size), conv_out_size),
        "f1b": uniform(ks[7], (512,), conv_out_size),
        "f2w": uniform(ks[8], (n_actions, 512), 512),
        "f2b": uniform(ks[9], (n_actions,), 512),
    }


def prepare_params(pt, input_shape):
    """PyTorch layout -> kernel layout (NHWC im2col GEMM, bf16, no K padding)."""
    _, hh, ww = input_shape
    h1, w1 = _conv_out(hh, 8, 4), _conv_out(ww, 8, 4)
    h2, w2 = _conv_out(h1, 4, 2), _conv_out(w1, 4, 2)
    h3, w3 = _conv_out(h2, 3, 1), _conv_out(w2, 3, 1)

    def conv_w(wt):
        oc, c, kh, kw = wt.shape
        return wt.transpose(2, 3, 1, 0).reshape(kh * kw * c, oc).astype(jnp.bfloat16)

    # fc1: rows permuted from PyTorch's NCHW flatten to the NHWC flatten order
    # (identity here because conv3's output is 1x1 spatially).
    f1 = pt["f1w"].reshape(512, 64, h3, w3).transpose(0, 2, 3, 1)
    f1 = f1.reshape(512, -1).T.astype(jnp.bfloat16)          # [conv_out, 512]

    # fc2: [n_actions, 512] -> [512, Np] with N padded to one 128-lane slab.
    f2 = pt["f2w"].T
    n_act = f2.shape[1]
    np_pad = _round_up(max(n_act, 128), 128)
    f2 = jnp.pad(f2, ((0, 0), (0, np_pad - n_act))).astype(jnp.bfloat16)
    b2 = jnp.pad(pt["f2b"], (0, np_pad - n_act)).astype(jnp.float32)

    return {
        "c1w": conv_w(pt["c1w"]), "c1b": pt["c1b"].astype(jnp.float32),
        "c2w": conv_w(pt["c2w"]), "c2b": pt["c2b"].astype(jnp.float32),
        "c3w": conv_w(pt["c3w"]), "c3b": pt["c3b"].astype(jnp.float32),
        "f1w": f1, "f1b": pt["f1b"].astype(jnp.float32),
        "f2w": f2, "f2b": b2,
    }


# ----------------------------------------------------------------------------
# Forward pass (takes NCHW input, matching the PyTorch module).
# ----------------------------------------------------------------------------
def dqn_forward(params, x_nchw, n_actions):
    x = x_nchw.transpose(0, 2, 3, 1)                         # NCHW -> NHWC once
    h1 = conv1_lane_dense(x, params["c1w"], params["c1b"], 8, 8, 4)
    return conv_tail_fused(h1, params, n_actions)


def dqn_reference(pt, x_nchw):
    """Pure-JAX fp32 reference with PyTorch layout/semantics."""
    def conv(x, w, b, s):
        y = lax.conv_general_dilated(x, w, (s, s), "VALID",
                                     dimension_numbers=("NCHW", "OIHW", "NCHW"))
        return jax.nn.relu(y + b.reshape(1, -1, 1, 1))
    x = conv(x_nchw, pt["c1w"], pt["c1b"], 4)
    x = conv(x, pt["c2w"], pt["c2b"], 2)
    x = conv(x, pt["c3w"], pt["c3b"], 1)
    flat = x.reshape(x.shape[0], -1)                         # NCHW flatten
    h = jax.nn.relu(flat @ pt["f1w"].T + pt["f1b"])
    return h @ pt["f2w"].T + pt["f2b"]


if __name__ == "__main__":
    key = jax.random.PRNGKey(0)
    k_params, k_input = jax.random.split(key)

    # Small conv-arithmetic-consistent shapes:
    #   36 -(k8,s4)-> 8 -(k4,s2)-> 3 -(k3,s1)-> 1  => conv_out_size = 64
    batch = 2
    input_shape = (4, 36, 36)      # (C, H, W), stacked-frame style
    n_actions = 6                  # ALE/Bowling-v5 action space size

    pt_params = init_dqn_params(k_params, input_shape, n_actions)
    params = prepare_params(pt_params, input_shape)
    x = jax.random.normal(k_input, (batch,) + input_shape, dtype=jnp.float32)

    fwd = jax.jit(dqn_forward, static_argnums=(2,))
    q_values = jax.block_until_ready(fwd(params, x, n_actions))

    assert q_values.shape == (batch, n_actions), q_values.shape
    assert q_values.dtype == jnp.float32
    assert bool(jnp.all(jnp.isfinite(q_values)))

    # Numerics check vs fp32 reference (bf16 MXU inputs => small drift only).
    q_ref = dqn_reference(pt_params, x)
    max_err = float(jnp.max(jnp.abs(q_values - q_ref)))
    assert bool(jnp.allclose(q_values, q_ref, atol=3e-2, rtol=3e-2)), max_err

    print("KERNEL_OK")
</pallas_src>

<mosaic_0001>
module attributes {stable_mosaic.version = 11 : i64} {
  func.func @_conv1_kernel(%arg0: i32, %arg1: memref<8x2048xf32, #tpu.memory_space<vmem>>, %arg2: memref<256x32xbf16, #tpu.memory_space<vmem>>, %arg3: memref<1x32xf32, #tpu.memory_space<vmem>>, %arg4: memref<8x256xf32, #tpu.memory_space<vmem>>) attributes {dimension_semantics = [#tpu.dimension_semantics<parallel>], iteration_bounds = array<i64: 2>, scalar_prefetch = 0 : i64, scratch_operands = 0 : i64, tpu.core_type = #tpu.core_type<tc>, window_params = [{transform_indices = @transform_0, window_bounds = array<i64: 8, 2048>}, {pipeline_mode = #tpu.pipeline_mode<synchronous>, transform_indices = @transform_1, window_bounds = array<i64: 256, 32>}, {pipeline_mode = #tpu.pipeline_mode<synchronous>, transform_indices = @transform_2, window_bounds = array<i64: 1, 32>}, {transform_indices = @transform_3, window_bounds = array<i64: 8, 256>}]} {
    %c0 = arith.constant 0 : index
    %c0_0 = arith.constant 0 : index
    %0 = vector.load %arg2[%c0, %c0_0] : memref<256x32xbf16, #tpu.memory_space<vmem>>, vector<256x32xbf16>
    %c0_1 = arith.constant 0 : index
    %c0_2 = arith.constant 0 : index
    %1 = vector.load %arg3[%c0_1, %c0_2] : memref<1x32xf32, #tpu.memory_space<vmem>>, vector<1x32xf32>
    %c0_3 = arith.constant 0 : index
    %c0_4 = arith.constant 0 : index
    %2 = vector.load %arg1[%c0_3, %c0_4] : memref<8x2048xf32, #tpu.memory_space<vmem>>, vector<8x256xf32>
    %3 = arith.truncf %2 : vector<8x256xf32> to vector<8x256xbf16>
    %cst = arith.constant dense<0.000000e+00> : vector<8x32xf32>
    %4 = tpu.matmul %3, %0, %cst {dimension_numbers = #tpu.dot_dimension_numbers<[1], [0], [0], [1], [0, 0, 1, 1], [], []>} : vector<8x256xbf16>, vector<256x32xbf16>, vector<8x32xf32> -> vector<8x32xf32>
    %5 = vector.broadcast %1 : vector<1x32xf32> to vector<8x32xf32>
    %6 = arith.addf %4, %5 : vector<8x32xf32>
    %cst_5 = arith.constant 0.000000e+00 : f32
    %7 = vector.broadcast %cst_5 : f32 to vector<8x32xf32>
    %8 = arith.maximumf %6, %7 : vector<8x32xf32>
    %c0_6 = arith.constant 0 : index
    %c0_7 = arith.constant 0 : index
    %9 = vector.load %arg4[%c0_6, %c0_7] : memref<8x256xf32, #tpu.memory_space<vmem>>, vector<8x32xf32>
    tpu.vector_store %arg4[%c0_6, %c0_7], %8 {strides = array<i32>} : memref<8x256xf32, #tpu.memory_space<vmem>>, vector<8x32xf32>,
    %c0_8 = arith.constant 0 : index
    %c256 = arith.constant 256 : index
    %10 = vector.load %arg1[%c0_8, %c256] : memref<8x2048xf32, #tpu.memory_space<vmem>>, vector<8x256xf32>
    %11 = arith.truncf %10 : vector<8x256xf32> to vector<8x256xbf16>
    %cst_9 = arith.constant dense<0.000000e+00> : vector<8x32xf32>
    %12 = tpu.matmul %11, %0, %cst_9 {dimension_numbers = #tpu.dot_dimension_numbers<[1], [0], [0], [1], [0, 0, 1, 1], [], []>} : vector<8x256xbf16>, vector<256x32xbf16>, vector<8x32xf32> -> vector<8x32xf32>
    %13 = vector.broadcast %1 : vector<1x32xf32> to vector<8x32xf32>
    %14 = arith.addf %12, %13 : vector<8x32xf32>
    %cst_10 = arith.constant 0.000000e+00 : f32
    %15 = vector.broadcast %cst_10 : f32 to vector<8x32xf32>
    %16 = arith.maximumf %14, %15 : vector<8x32xf32>
    %c0_11 = arith.constant 0 : index
    %c32 = arith.constant 32 : index
    %17 = vector.load %arg4[%c0_11, %c32] : memref<8x256xf32, #tpu.memory_space<vmem>>, vector<8x32xf32>
    tpu.vector_store %arg4[%c0_11, %c32], %16 {strides = array<i32>} : memref<8x256xf32, #tpu.memory_space<vmem>>, vector<8x32xf32>,
    %c0_12 = arith.constant 0 : index
    %c512 = arith.constant 512 : index
    %18 = vector.load %arg1[%c0_12, %c512] : memref<8x2048xf32, #tpu.memory_space<vmem>>, vector<8x256xf32>
    %19 = arith.truncf %18 : vector<8x256xf32> to vector<8x256xbf16>
    %cst_13 = arith.constant dense<0.000000e+00> : vector<8x32xf32>
    %20 = tpu.matmul %19, %0, %cst_13 {dimension_numbers = #tpu.dot_dimension_numbers<[1], [0], [0], [1], [0, 0, 1, 1], [], []>} : vector<8x256xbf16>, vector<256x32xbf16>, vector<8x32xf32> -> vector<8x32xf32>
    %21 = vector.broadcast %1 : vector<1x32xf32> to vector<8x32xf32>
    %22 = arith.addf %20, %21 : vector<8x32xf32>
    %cst_14 = arith.constant 0.000000e+00 : f32
    %23 = vector.broadcast %cst_14 : f32 to vector<8x32xf32>
    %24 = arith.maximumf %22, %23 : vector<8x32xf32>
    %c0_15 = arith.constant 0 : index
    %c64 = arith.constant 64 : index
    %25 = vector.load %arg4[%c0_15, %c64] : memref<8x256xf32, #tpu.memory_space<vmem>>, vector<8x32xf32>
    tpu.vector_store %arg4[%c0_15, %c64], %24 {strides = array<i32>} : memref<8x256xf32, #tpu.memory_space<vmem>>, vector<8x32xf32>,
    %c0_16 = arith.constant 0 : index
    %c768 = arith.constant 768 : index
    %26 = vector.load %arg1[%c0_16, %c768] : memref<8x2048xf32, #tpu.memory_space<vmem>>, vector<8x256xf32>
    %27 = arith.truncf %26 : vector<8x256xf32> to vector<8x256xbf16>
    %cst_17 = arith.constant dense<0.000000e+00> : vector<8x32xf32>
    %28 = tpu.matmul %27, %0, %cst_17 {dimension_numbers = #tpu.dot_dimension_numbers<[1], [0], [0], [1], [0, 0, 1, 1], [], []>} : vector<8x256xbf16>, vector<256x32xbf16>, vector<8x32xf32> -> vector<8x32xf32>
    %29 = vector.broadcast %1 : vector<1x32xf32> to vector<8x32xf32>
    %30 = arith.addf %28, %29 : vector<8x32xf32>
    %cst_18 = arith.constant 0.000000e+00 : f32
    %31 = vector.broadcast %cst_18 : f32 to vector<8x32xf32>
    %32 = arith.maximumf %30, %31 : vector<8x32xf32>
    %c0_19 = arith.constant 0 : index
    %c96 = arith.constant 96 : index
    %33 = vector.load %arg4[%c0_19, %c96] : memref<8x256xf32, #tpu.memory_space<vmem>>, vector<8x32xf32>
    tpu.vector_store %arg4[%c0_19, %c96], %32 {strides = array<i32>} : memref<8x256xf32, #tpu.memory_space<vmem>>, vector<8x32xf32>,
    %c0_20 = arith.constant 0 : index
    %c1024 = arith.constant 1024 : index
    %34 = vector.load %arg1[%c0_20, %c1024] : memref<8x2048xf32, #tpu.memory_space<vmem>>, vector<8x256xf32>
    %35 = arith.truncf %34 : vector<8x256xf32> to vector<8x256xbf16>
    %cst_21 = arith.constant dense<0.000000e+00> : vector<8x32xf32>
    %36 = tpu.matmul %35, %0, %cst_21 {dimension_numbers = #tpu.dot_dimension_numbers<[1], [0], [0], [1], [0, 0, 1, 1], [], []>} : vector<8x256xbf16>, vector<256x32xbf16>, vector<8x32xf32> -> vector<8x32xf32>
    %37 = vector.broadcast %1 : vector<1x32xf32> to vector<8x32xf32>
    %38 = arith.addf %36, %37 : vector<8x32xf32>
    %cst_22 = arith.constant 0.000000e+00 : f32
    %39 = vector.broadcast %cst_22 : f32 to vector<8x32xf32>
    %40 = arith.maximumf %38, %39 : vector<8x32xf32>
    %c0_23 = arith.constant 0 : index
    %c128 = arith.constant 128 : index
    %41 = vector.load %arg4[%c0_23, %c128] : memref<8x256xf32, #tpu.memory_space<vmem>>, vector<8x32xf32>
    tpu.vector_store %arg4[%c0_23, %c128], %40 {strides = array<i32>} : memref<8x256xf32, #tpu.memory_space<vmem>>, vector<8x32xf32>,
    %c0_24 = arith.constant 0 : index
    %c1280 = arith.constant 1280 : index
    %42 = vector.load %arg1[%c0_24, %c1280] : memref<8x2048xf32, #tpu.memory_space<vmem>>, vector<8x256xf32>
    %43 = arith.truncf %42 : vector<8x256xf32> to vector<8x256xbf16>
    %cst_25 = arith.constant dense<0.000000e+00> : vector<8x32xf32>
    %44 = tpu.matmul %43, %0, %cst_25 {dimension_numbers = #tpu.dot_dimension_numbers<[1], [0], [0], [1], [0, 0, 1, 1], [], []>} : vector<8x256xbf16>, vector<256x32xbf16>, vector<8x32xf32> -> vector<8x32xf32>
    %45 = vector.broadcast %1 : vector<1x32xf32> to vector<8x32xf32>
    %46 = arith.addf %44, %45 : vector<8x32xf32>
    %cst_26 = arith.constant 0.000000e+00 : f32
    %47 = vector.broadcast %cst_26 : f32 to vector<8x32xf32>
    %48 = arith.maximumf %46, %47 : vector<8x32xf32>
    %c0_27 = arith.constant 0 : index
    %c160 = arith.constant 160 : index
    %49 = vector.load %arg4[%c0_27, %c160] : memref<8x256xf32, #tpu.memory_space<vmem>>, vector<8x32xf32>
    tpu.vector_store %arg4[%c0_27, %c160], %48 {strides = array<i32>} : memref<8x256xf32, #tpu.memory_space<vmem>>, vector<8x32xf32>,
    %c0_28 = arith.constant 0 : index
    %c1536 = arith.constant 1536 : index
    %50 = vector.load %arg1[%c0_28, %c1536] : memref<8x2048xf32, #tpu.memory_space<vmem>>, vector<8x256xf32>
    %51 = arith.truncf %50 : vector<8x256xf32> to vector<8x256xbf16>
    %cst_29 = arith.constant dense<0.000000e+00> : vector<8x32xf32>
    %52 = tpu.matmul %51, %0, %cst_29 {dimension_numbers = #tpu.dot_dimension_numbers<[1], [0], [0], [1], [0, 0, 1, 1], [], []>} : vector<8x256xbf16>, vector<256x32xbf16>, vector<8x32xf32> -> vector<8x32xf32>
    %53 = vector.broadcast %1 : vector<1x32xf32> to vector<8x32xf32>
    %54 = arith.addf %52, %53 : vector<8x32xf32>
    %cst_30 = arith.constant 0.000000e+00 : f32
    %55 = vector.broadcast %cst_30 : f32 to vector<8x32xf32>
    %56 = arith.maximumf %54, %55 : vector<8x32xf32>
    %c0_31 = arith.constant 0 : index
    %c192 = arith.constant 192 : index
    %57 = vector.load %arg4[%c0_31, %c192] : memref<8x256xf32, #tpu.memory_space<vmem>>, vector<8x32xf32>
    tpu.vector_store %arg4[%c0_31, %c192], %56 {strides = array<i32>} : memref<8x256xf32, #tpu.memory_space<vmem>>, vector<8x32xf32>,
    %c0_32 = arith.constant 0 : index
    %c1792 = arith.constant 1792 : index
    %58 = vector.load %arg1[%c0_32, %c1792] : memref<8x2048xf32, #tpu.memory_space<vmem>>, vector<8x256xf32>
    %59 = arith.truncf %58 : vector<8x256xf32> to vector<8x256xbf16>
    %cst_33 = arith.constant dense<0.000000e+00> : vector<8x32xf32>
    %60 = tpu.matmul %59, %0, %cst_33 {dimension_numbers = #tpu.dot_dimension_numbers<[1], [0], [0], [1], [0, 0, 1, 1], [], []>} : vector<8x256xbf16>, vector<256x32xbf16>, vector<8x32xf32> -> vector<8x32xf32>
    %61 = vector.broadcast %1 : vector<1x32xf32> to vector<8x32xf32>
    %62 = arith.addf %60, %61 : vector<8x32xf32>
    %cst_34 = arith.constant 0.000000e+00 : f32
    %63 = vector.broadcast %cst_34 : f32 to vector<8x32xf32>
    %64 = arith.maximumf %62, %63 : vector<8x32xf32>
    %c0_35 = arith.constant 0 : index
    %c224 = arith.constant 224 : index
    %65 = vector.load %arg4[%c0_35, %c224] : memref<8x256xf32, #tpu.memory_space<vmem>>, vector<8x32xf32>
    tpu.vector_store %arg4[%c0_35, %c224], %64 {strides = array<i32>} : memref<8x256xf32, #tpu.memory_space<vmem>>, vector<8x32xf32>,
    return
  }
  func.func @transform_0(%arg0: i32) -> (i32, i32) {
    %c0_i32 = arith.constant 0 : i32
    %c0_i32_0 = arith.constant 0 : i32
    return %arg0, %c0_i32 : i32, i32
  }
  func.func @transform_1(%arg0: i32) -> (i32, i32) {
    %c0_i32 = arith.constant 0 : i32
    %c0_i32_0 = arith.constant 0 : i32
    %c0_i32_1 = arith.constant 0 : i32
    return %c0_i32, %c0_i32_0 : i32, i32
  }
  func.func @transform_2(%arg0: i32) -> (i32, i32) {
    %c0_i32 = arith.constant 0 : i32
    %c0_i32_0 = arith.constant 0 : i32
    %c0_i32_1 = arith.constant 0 : i32
    return %c0_i32, %c0_i32_0 : i32, i32
  }
  func.func @transform_3(%arg0: i32) -> (i32, i32) {
    %c0_i32 = arith.constant 0 : i32
    %c0_i32_0 = arith.constant 0 : i32
    return %arg0, %c0_i32 : i32, i32
  }
}

module attributes {stable_mosaic.version = 11 : i64} {
  func.func @_tail_kernel(%arg0: i32, %arg1: memref<9x2x512xbf16, #tpu.memory_space<vmem>>, %arg2: memref<512x64xbf16, #tpu.memory_space<vmem>>, %arg3: memref<1x64xf32, #tpu.memory_space<vmem>>, %arg4: memref<576x64xbf16, #tpu.memory_space<vmem>>, %arg5: memref<1x64xf32, #tpu.memory_space<vmem>>, %arg6: memref<64x512xbf16, #tpu.memory_space<vmem>>, %arg7: memref<1x512xf32, #tpu.memory_space<vmem>>, %arg8: memref<512x128xbf16, #tpu.memory_space<vmem>>, %arg9: memref<1x128xf32, #tpu.memory_space<vmem>>, %arg10: memref<2x128xf32, #tpu.memory_space<vmem>>) attributes {dimension_semantics = [#tpu.dimension_semantics<parallel>], iteration_bounds = array<i64: 1>, scalar_prefetch = 0 : i64, scratch_operands = 0 : i64, tpu.core_type = #tpu.core_type<tc>, window_params = [{transform_indices = @transform_0, window_bounds = array<i64: 9, 2, 512>}, {pipeline_mode = #tpu.pipeline_mode<synchronous>, transform_indices = @transform_1, window_bounds = array<i64: 512, 64>}, {pipeline_mode = #tpu.pipeline_mode<synchronous>, transform_indices = @transform_2, window_bounds = array<i64: 1, 64>}, {pipeline_mode = #tpu.pipeline_mode<synchronous>, transform_indices = @transform_3, window_bounds = array<i64: 576, 64>}, {pipeline_mode = #tpu.pipeline_mode<synchronous>, transform_indices = @transform_4, window_bounds = array<i64: 1, 64>}, {pipeline_mode = #tpu.pipeline_mode<synchronous>, transform_indices = @transform_5, window_bounds = array<i64: 64, 512>}, {pipeline_mode = #tpu.pipeline_mode<synchronous>, transform_indices = @transform_6, window_bounds = array<i64: 1, 512>}, {pipeline_mode = #tpu.pipeline_mode<synchronous>, transform_indices = @transform_7, window_bounds = array<i64: 512, 128>}, {pipeline_mode = #tpu.pipeline_mode<synchronous>, transform_indices = @transform_8, window_bounds = array<i64: 1, 128>}, {transform_indices = @transform_9, window_bounds = array<i64: 2, 128>}]} {
    %c0 = arith.constant 0 : index
    %c0_0 = arith.constant 0 : index
    %0 = vector.load %arg2[%c0, %c0_0] : memref<512x64xbf16, #tpu.memory_space<vmem>>, vector<512x64xbf16>
    %c0_1 = arith.constant 0 : index
    %c0_2 = arith.constant 0 : index
    %1 = vector.load %arg3[%c0_1, %c0_2] : memref<1x64xf32, #tpu.memory_space<vmem>>, vector<1x64xf32>
    %cst = arith.constant 0.000000e+00 : f32
    %2 = vector.broadcast %cst : f32 to vector<2x64xf32>
    %c0_3 = arith.constant 0 : index
    %c0_4 = arith.constant 0 : index
    %c0_5 = arith.constant 0 : index
    %3 = vector.load %arg1[%c0_3, %c0_4, %c0_5] : memref<9x2x512xbf16, #tpu.memory_space<vmem>>, vector<1x2x512xbf16>
    %4 = vector.shape_cast %3 : vector<1x2x512xbf16> to vector<2x512xbf16>
    %cst_6 = arith.constant dense<0.000000e+00> : vector<2x64xf32>
    %5 = tpu.matmul %4, %0, %cst_6 {dimension_numbers = #tpu.dot_dimension_numbers<[1], [0], [0], [1], [0, 0, 1, 1], [], []>} : vector<2x512xbf16>, vector<512x64xbf16>, vector<2x64xf32> -> vector<2x64xf32>
    %6 = vector.broadcast %1 : vector<1x64xf32> to vector<2x64xf32>
    %7 = arith.addf %5, %6 : vector<2x64xf32>
    %cst_7 = arith.constant 0.000000e+00 : f32
    %8 = vector.broadcast %cst_7 : f32 to vector<2x64xf32>
    %9 = arith.maximumf %7, %8 : vector<2x64xf32>
    %10 = arith.truncf %9 : vector<2x64xf32> to vector<2x64xbf16>
    %c0_8 = arith.constant 0 : index
    %c0_9 = arith.constant 0 : index
    %11 = vector.load %arg4[%c0_8, %c0_9] : memref<576x64xbf16, #tpu.memory_space<vmem>>, vector<64x64xbf16>
    %cst_10 = arith.constant dense<0.000000e+00> : vector<2x64xf32>
    %12 = tpu.matmul %10, %11, %cst_10 {dimension_numbers = #tpu.dot_dimension_numbers<[1], [0], [0], [1], [0, 0, 1, 1], [], []>} : vector<2x64xbf16>, vector<64x64xbf16>, vector<2x64xf32> -> vector<2x64xf32>
    %13 = arith.addf %2, %12 : vector<2x64xf32>
    %c1 = arith.constant 1 : index
    %c0_11 = arith.constant 0 : index
    %c0_12 = arith.constant 0 : index
    %14 = vector.load %arg1[%c1, %c0_11, %c0_12] : memref<9x2x512xbf16, #tpu.memory_space<vmem>>, vector<1x2x512xbf16>
    %15 = vector.shape_cast %14 : vector<1x2x512xbf16> to vector<2x512xbf16>
    %cst_13 = arith.constant dense<0.000000e+00> : vector<2x64xf32>
    %16 = tpu.matmul %15, %0, %cst_13 {dimension_numbers = #tpu.dot_dimension_numbers<[1], [0], [0], [1], [0, 0, 1, 1], [], []>} : vector<2x512xbf16>, vector<512x64xbf16>, vector<2x64xf32> -> vector<2x64xf32>
    %17 = vector.broadcast %1 : vector<1x64xf32> to vector<2x64xf32>
    %18 = arith.addf %16, %17 : vector<2x64xf32>
    %cst_14 = arith.constant 0.000000e+00 : f32
    %19 = vector.broadcast %cst_14 : f32 to vector<2x64xf32>
    %20 = arith.maximumf %18, %19 : vector<2x64xf32>
    %21 = arith.truncf %20 : vector<2x64xf32> to vector<2x64xbf16>
    %c64 = arith.constant 64 : index
    %c0_15 = arith.constant 0 : index
    %22 = vector.load %arg4[%c64, %c0_15] : memref<576x64xbf16, #tpu.memory_space<vmem>>, vector<64x64xbf16>
    %cst_16 = arith.constant dense<0.000000e+00> : vector<2x64xf32>
    %23 = tpu.matmul %21, %22, %cst_16 {dimension_numbers = #tpu.dot_dimension_numbers<[1], [0], [0], [1], [0, 0, 1, 1], [], []>} : vector<2x64xbf16>, vector<64x64xbf16>, vector<2x64xf32> -> vector<2x64xf32>
    %24 = arith.addf %13, %23 : vector<2x64xf32>
    %c2 = arith.constant 2 : index
    %c0_17 = arith.constant 0 : index
    %c0_18 = arith.constant 0 : index
    %25 = vector.load %arg1[%c2, %c0_17, %c0_18] : memref<9x2x512xbf16, #tpu.memory_space<vmem>>, vector<1x2x512xbf16>
    %26 = vector.shape_cast %25 : vector<1x2x512xbf16> to vector<2x512xbf16>
    %cst_19 = arith.constant dense<0.000000e+00> : vector<2x64xf32>
    %27 = tpu.matmul %26, %0, %cst_19 {dimension_numbers = #tpu.dot_dimension_numbers<[1], [0], [0], [1], [0, 0, 1, 1], [], []>} : vector<2x512xbf16>, vector<512x64xbf16>, vector<2x64xf32> -> vector<2x64xf32>
    %28 = vector.broadcast %1 : vector<1x64xf32> to vector<2x64xf32>
    %29 = arith.addf %27, %28 : vector<2x64xf32>
    %cst_20 = arith.constant 0.000000e+00 : f32
    %30 = vector.broadcast %cst_20 : f32 to vector<2x64xf32>
    %31 = arith.maximumf %29, %30 : vector<2x64xf32>
    %32 = arith.truncf %31 : vector<2x64xf32> to vector<2x64xbf16>
    %c128 = arith.constant 128 : index
    %c0_21 = arith.constant 0 : index
    %33 = vector.load %arg4[%c128, %c0_21] : memref<576x64xbf16, #tpu.memory_space<vmem>>, vector<64x64xbf16>
    %cst_22 = arith.constant dense<0.000000e+00> : vector<2x64xf32>
    %34 = tpu.matmul %32, %33, %cst_22 {dimension_numbers = #tpu.dot_dimension_numbers<[1], [0], [0], [1], [0, 0, 1, 1], [], []>} : vector<2x64xbf16>, vector<64x64xbf16>, vector<2x64xf32> -> vector<2x64xf32>
    %35 = arith.addf %24, %34 : vector<2x64xf32>
    %c3 = arith.constant 3 : index
    %c0_23 = arith.constant 0 : index
    %c0_24 = arith.constant 0 : index
    %36 = vector.load %arg1[%c3, %c0_23, %c0_24] : memref<9x2x512xbf16, #tpu.memory_space<vmem>>, vector<1x2x512xbf16>
    %37 = vector.shape_cast %36 : vector<1x2x512xbf16> to vector<2x512xbf16>
    %cst_25 = arith.constant dense<0.000000e+00> : vector<2x64xf32>
    %38 = tpu.matmul %37, %0, %cst_25 {dimension_numbers = #tpu.dot_dimension_numbers<[1], [0], [0], [1], [0, 0, 1, 1], [], []>} : vector<2x512xbf16>, vector<512x64xbf16>, vector<2x64xf32> -> vector<2x64xf32>
    %39 = vector.broadcast %1 : vector<1x64xf32> to vector<2x64xf32>
    %40 = arith.addf %38, %39 : vector<2x64xf32>
    %cst_26 = arith.constant 0.000000e+00 : f32
    %41 = vector.broadcast %cst_26 : f32 to vector<2x64xf32>
    %42 = arith.maximumf %40, %41 : vector<2x64xf32>
    %43 = arith.truncf %42 : vector<2x64xf32> to vector<2x64xbf16>
    %c192 = arith.constant 192 : index
    %c0_27 = arith.constant 0 : index
    %44 = vector.load %arg4[%c192, %c0_27] : memref<576x64xbf16, #tpu.memory_space<vmem>>, vector<64x64xbf16>
    %cst_28 = arith.constant dense<0.000000e+00> : vector<2x64xf32>
    %45 = tpu.matmul %43, %44, %cst_28 {dimension_numbers = #tpu.dot_dimension_numbers<[1], [0], [0], [1], [0, 0, 1, 1], [], []>} : vector<2x64xbf16>, vector<64x64xbf16>, vector<2x64xf32> -> vector<2x64xf32>
    %46 = arith.addf %35, %45 : vector<2x64xf32>
    %c4 = arith.constant 4 : index
    %c0_29 = arith.constant 0 : index
    %c0_30 = arith.constant 0 : index
    %47 = vector.load %arg1[%c4, %c0_29, %c0_30] : memref<9x2x512xbf16, #tpu.memory_space<vmem>>, vector<1x2x512xbf16>
    %48 = vector.shape_cast %47 : vector<1x2x512xbf16> to vector<2x512xbf16>
    %cst_31 = arith.constant dense<0.000000e+00> : vector<2x64xf32>
    %49 = tpu.matmul %48, %0, %cst_31 {dimension_numbers = #tpu.dot_dimension_numbers<[1], [0], [0], [1], [0, 0, 1, 1], [], []>} : vector<2x512xbf16>, vector<512x64xbf16>, vector<2x64xf32> -> vector<2x64xf32>
    %50 = vector.broadcast %1 : vector<1x64xf32> to vector<2x64xf32>
    %51 = arith.addf %49, %50 : vector<2x64xf32>
    %cst_32 = arith.constant 0.000000e+00 : f32
    %52 = vector.broadcast %cst_32 : f32 to vector<2x64xf32>
    %53 = arith.maximumf %51, %52 : vector<2x64xf32>
    %54 = arith.truncf %53 : vector<2x64xf32> to vector<2x64xbf16>
    %c256 = arith.constant 256 : index
    %c0_33 = arith.constant 0 : index
    %55 = vector.load %arg4[%c256, %c0_33] : memref<576x64xbf16, #tpu.memory_space<vmem>>, vector<64x64xbf16>
    %cst_34 = arith.constant dense<0.000000e+00> : vector<2x64xf32>
    %56 = tpu.matmul %54, %55, %cst_34 {dimension_numbers = #tpu.dot_dimension_numbers<[1], [0], [0], [1], [0, 0, 1, 1], [], []>} : vector<2x64xbf16>, vector<64x64xbf16>, vector<2x64xf32> -> vector<2x64xf32>
    %57 = arith.addf %46, %56 : vector<2x64xf32>
    %c5 = arith.constant 5 : index
    %c0_35 = arith.constant 0 : index
    %c0_36 = arith.constant 0 : index
    %58 = vector.load %arg1[%c5, %c0_35, %c0_36] : memref<9x2x512xbf16, #tpu.memory_space<vmem>>, vector<1x2x512xbf16>
    %59 = vector.shape_cast %58 : vector<1x2x512xbf16> to vector<2x512xbf16>
    %cst_37 = arith.constant dense<0.000000e+00> : vector<2x64xf32>
    %60 = tpu.matmul %59, %0, %cst_37 {dimension_numbers = #tpu.dot_dimension_numbers<[1], [0], [0], [1], [0, 0, 1, 1], [], []>} : vector<2x512xbf16>, vector<512x64xbf16>, vector<2x64xf32> -> vector<2x64xf32>
    %61 = vector.broadcast %1 : vector<1x64xf32> to vector<2x64xf32>
    %62 = arith.addf %60, %61 : vector<2x64xf32>
    %cst_38 = arith.constant 0.000000e+00 : f32
    %63 = vector.broadcast %cst_38 : f32 to vector<2x64xf32>
    %64 = arith.maximumf %62, %63 : vector<2x64xf32>
    %65 = arith.truncf %64 : vector<2x64xf32> to vector<2x64xbf16>
    %c320 = arith.constant 320 : index
    %c0_39 = arith.constant 0 : index
    %66 = vector.load %arg4[%c320, %c0_39] : memref<576x64xbf16, #tpu.memory_space<vmem>>, vector<64x64xbf16>
    %cst_40 = arith.constant dense<0.000000e+00> : vector<2x64xf32>
    %67 = tpu.matmul %65, %66, %cst_40 {dimension_numbers = #tpu.dot_dimension_numbers<[1], [0], [0], [1], [0, 0, 1, 1], [], []>} : vector<2x64xbf16>, vector<64x64xbf16>, vector<2x64xf32> -> vector<2x64xf32>
    %68 = arith.addf %57, %67 : vector<2x64xf32>
    %c6 = arith.constant 6 : index
    %c0_41 = arith.constant 0 : index
    %c0_42 = arith.constant 0 : index
    %69 = vector.load %arg1[%c6, %c0_41, %c0_42] : memref<9x2x512xbf16, #tpu.memory_space<vmem>>, vector<1x2x512xbf16>
    %70 = vector.shape_cast %69 : vector<1x2x512xbf16> to vector<2x512xbf16>
    %cst_43 = arith.constant dense<0.000000e+00> : vector<2x64xf32>
    %71 = tpu.matmul %70, %0, %cst_43 {dimension_numbers = #tpu.dot_dimension_numbers<[1], [0], [0], [1], [0, 0, 1, 1], [], []>} : vector<2x512xbf16>, vector<512x64xbf16>, vector<2x64xf32> -> vector<2x64xf32>
    %72 = vector.broadcast %1 : vector<1x64xf32> to vector<2x64xf32>
    %73 = arith.addf %71, %72 : vector<2x64xf32>
    %cst_44 = arith.constant 0.000000e+00 : f32
    %74 = vector.broadcast %cst_44 : f32 to vector<2x64xf32>
    %75 = arith.maximumf %73, %74 : vector<2x64xf32>
    %76 = arith.truncf %75 : vector<2x64xf32> to vector<2x64xbf16>
    %c384 = arith.constant 384 : index
    %c0_45 = arith.constant 0 : index
    %77 = vector.load %arg4[%c384, %c0_45] : memref<576x64xbf16, #tpu.memory_space<vmem>>, vector<64x64xbf16>
    %cst_46 = arith.constant dense<0.000000e+00> : vector<2x64xf32>
    %78 = tpu.matmul %76, %77, %cst_46 {dimension_numbers = #tpu.dot_dimension_numbers<[1], [0], [0], [1], [0, 0, 1, 1], [], []>} : vector<2x64xbf16>, vector<64x64xbf16>, vector<2x64xf32> -> vector<2x64xf32>
    %79 = arith.addf %68, %78 : vector<2x64xf32>
    %c7 = arith.constant 7 : index
    %c0_47 = arith.constant 0 : index
    %c0_48 = arith.constant 0 : index
    %80 = vector.load %arg1[%c7, %c0_47, %c0_48] : memref<9x2x512xbf16, #tpu.memory_space<vmem>>, vector<1x2x512xbf16>
    %81 = vector.shape_cast %80 : vector<1x2x512xbf16> to vector<2x512xbf16>
    %cst_49 = arith.constant dense<0.000000e+00> : vector<2x64xf32>
    %82 = tpu.matmul %81, %0, %cst_49 {dimension_numbers = #tpu.dot_dimension_numbers<[1], [0], [0], [1], [0, 0, 1, 1], [], []>} : vector<2x512xbf16>, vector<512x64xbf16>, vector<2x64xf32> -> vector<2x64xf32>
    %83 = vector.broadcast %1 : vector<1x64xf32> to vector<2x64xf32>
    %84 = arith.addf %82, %83 : vector<2x64xf32>
    %cst_50 = arith.constant 0.000000e+00 : f32
    %85 = vector.broadcast %cst_50 : f32 to vector<2x64xf32>
    %86 = arith.maximumf %84, %85 : vector<2x64xf32>
    %87 = arith.truncf %86 : vector<2x64xf32> to vector<2x64xbf16>
    %c448 = arith.constant 448 : index
    %c0_51 = arith.constant 0 : index
    %88 = vector.load %arg4[%c448, %c0_51] : memref<576x64xbf16, #tpu.memory_space<vmem>>, vector<64x64xbf16>
    %cst_52 = arith.constant dense<0.000000e+00> : vector<2x64xf32>
    %89 = tpu.matmul %87, %88, %cst_52 {dimension_numbers = #tpu.dot_dimension_numbers<[1], [0], [0], [1], [0, 0, 1, 1], [], []>} : vector<2x64xbf16>, vector<64x64xbf16>, vector<2x64xf32> -> vector<2x64xf32>
    %90 = arith.addf %79, %89 : vector<2x64xf32>
    %c8 = arith.constant 8 : index
    %c0_53 = arith.constant 0 : index
    %c0_54 = arith.constant 0 : index
    %91 = vector.load %arg1[%c8, %c0_53, %c0_54] : memref<9x2x512xbf16, #tpu.memory_space<vmem>>, vector<1x2x512xbf16>
    %92 = vector.shape_cast %91 : vector<1x2x512xbf16> to vector<2x512xbf16>
    %cst_55 = arith.constant dense<0.000000e+00> : vector<2x64xf32>
    %93 = tpu.matmul %92, %0, %cst_55 {dimension_numbers = #tpu.dot_dimension_numbers<[1], [0], [0], [1], [0, 0, 1, 1], [], []>} : vector<2x512xbf16>, vector<512x64xbf16>, vector<2x64xf32> -> vector<2x64xf32>
    %94 = vector.broadcast %1 : vector<1x64xf32> to vector<2x64xf32>
    %95 = arith.addf %93, %94 : vector<2x64xf32>
    %cst_56 = arith.constant 0.000000e+00 : f32
    %96 = vector.broadcast %cst_56 : f32 to vector<2x64xf32>
    %97 = arith.maximumf %95, %96 : vector<2x64xf32>
    %98 = arith.truncf %97 : vector<2x64xf32> to vector<2x64xbf16>
    %c512 = arith.constant 512 : index
    %c0_57 = arith.constant 0 : index
    %99 = vector.load %arg4[%c512, %c0_57] : memref<576x64xbf16, #tpu.memory_space<vmem>>, vector<64x64xbf16>
    %cst_58 = arith.constant dense<0.000000e+00> : vector<2x64xf32>
    %100 = tpu.matmul %98, %99, %cst_58 {dimension_numbers = #tpu.dot_dimension_numbers<[1], [0], [0], [1], [0, 0, 1, 1], [], []>} : vector<2x64xbf16>, vector<64x64xbf16>, vector<2x64xf32> -> vector<2x64xf32>
    %101 = arith.addf %90, %100 : vector<2x64xf32>
    %c0_59 = arith.constant 0 : index
    %c0_60 = arith.constant 0 : index
    %102 = vector.load %arg5[%c0_59, %c0_60] : memref<1x64xf32, #tpu.memory_space<vmem>>, vector<1x64xf32>
    %103 = vector.broadcast %102 : vector<1x64xf32> to vector<2x64xf32>
    %104 = arith.addf %101, %103 : vector<2x64xf32>
    %cst_61 = arith.constant 0.000000e+00 : f32
    %105 = vector.broadcast %cst_61 : f32 to vector<2x64xf32>
    %106 = arith.maximumf %104, %105 : vector<2x64xf32>
    %107 = arith.truncf %106 : vector<2x64xf32> to vector<2x64xbf16>
    %c0_62 = arith.constant 0 : index
    %c0_63 = arith.constant 0 : index
    %108 = vector.load %arg6[%c0_62, %c0_63] : memref<64x512xbf16, #tpu.memory_space<vmem>>, vector<64x512xbf16>
    %cst_64 = arith.constant dense<0.000000e+00> : vector<2x512xf32>
    %109 = tpu.matmul %107, %108, %cst_64 {dimension_numbers = #tpu.dot_dimension_numbers<[1], [0], [0], [1], [0, 0, 1, 1], [], []>} : vector<2x64xbf16>, vector<64x512xbf16>, vector<2x512xf32> -> vector<2x512xf32>
    %c0_65 = arith.constant 0 : index
    %c0_66 = arith.constant 0 : index
    %110 = vector.load %arg7[%c0_65, %c0_66] : memref<1x512xf32, #tpu.memory_space<vmem>>, vector<1x512xf32>
    %111 = vector.broadcast %110 : vector<1x512xf32> to vector<2x512xf32>
    %112 = arith.addf %109, %111 : vector<2x512xf32>
    %cst_67 = arith.constant 0.000000e+00 : f32
    %113 = vector.broadcast %cst_67 : f32 to vector<2x512xf32>
    %114 = arith.maximumf %112, %113 : vector<2x512xf32>
    %115 = arith.truncf %114 : vector<2x512xf32> to vector<2x512xbf16>
    %c0_68 = arith.constant 0 : index
    %c0_69 = arith.constant 0 : index
    %116 = vector.load %arg8[%c0_68, %c0_69] : memref<512x128xbf16, #tpu.memory_space<vmem>>, vector<512x128xbf16>
    %cst_70 = arith.constant dense<0.000000e+00> : vector<2x128xf32>
    %117 = tpu.matmul %115, %116, %cst_70 {dimension_numbers = #tpu.dot_dimension_numbers<[1], [0], [0], [1], [0, 0, 1, 1], [], []>} : vector<2x512xbf16>, vector<512x128xbf16>, vector<2x128xf32> -> vector<2x128xf32>
    %c0_71 = arith.constant 0 : index
    %c0_72 = arith.constant 0 : index
    %118 = vector.load %arg9[%c0_71, %c0_72] : memref<1x128xf32, #tpu.memory_space<vmem>>, vector<1x128xf32>
    %119 = vector.broadcast %118 : vector<1x128xf32> to vector<2x128xf32>
    %120 = arith.addf %117, %119 : vector<2x128xf32>
    %c0_73 = arith.constant 0 : index
    %c0_74 = arith.constant 0 : index
    %121 = vector.load %arg10[%c0_73, %c0_74] : memref<2x128xf32, #tpu.memory_space<vmem>>, vector<2x128xf32>
    tpu.vector_store %arg10[%c0_73, %c0_74], %120 {strides = array<i32>} : memref<2x128xf32, #tpu.memory_space<vmem>>, vector<2x128xf32>,
    return
  }
  func.func @transform_0(%arg0: i32) -> (i32, i32, i32) {
    %c0_i32 = arith.constant 0 : i32
    %c0_i32_0 = arith.constant 0 : i32
    %c0_i32_1 = arith.constant 0 : i32
    return %c0_i32, %arg0, %c0_i32_0 : i32, i32, i32
  }
  func.func @transform_1(%arg0: i32) -> (i32, i32) {
    %c0_i32 = arith.constant 0 : i32
    %c0_i32_0 = arith.constant 0 : i32
    %c0_i32_1 = arith.constant 0 : i32
    return %c0_i32, %c0_i32_0 : i32, i32
  }
  func.func @transform_2(%arg0: i32) -> (i32, i32) {
    %c0_i32 = arith.constant 0 : i32
    %c0_i32_0 = arith.constant 0 : i32
    %c0_i32_1 = arith.constant 0 : i32
    return %c0_i32, %c0_i32_0 : i32, i32
  }
  func.func @transform_3(%arg0: i32) -> (i32, i32) {
    %c0_i32 = arith.constant 0 : i32
    %c0_i32_0 = arith.constant 0 : i32
    %c0_i32_1 = arith.constant 0 : i32
    return %c0_i32, %c0_i32_0 : i32, i32
  }
  func.func @transform_4(%arg0: i32) -> (i32, i32) {
    %c0_i32 = arith.constant 0 : i32
    %c0_i32_0 = arith.constant 0 : i32
    %c0_i32_1 = arith.constant 0 : i32
    return %c0_i32, %c0_i32_0 : i32, i32
  }
  func.func @transform_5(%arg0: i32) -> (i32, i32) {
    %c0_i32 = arith.constant 0 : i32
    %c0_i32_0 = arith.constant 0 : i32
    %c0_i32_1 = arith.constant 0 : i32
    return %c0_i32, %c0_i32_0 : i32, i32
  }
  func.func @transform_6(%arg0: i32) -> (i32, i32) {
    %c0_i32 = arith.constant 0 : i32
    %c0_i32_0 = arith.constant 0 : i32
    %c0_i32_1 = arith.constant 0 : i32
    return %c0_i32, %c0_i32_0 : i32, i32
  }
  func.func @transform_7(%arg0: i32) -> (i32, i32) {
    %c0_i32 = arith.constant 0 : i32
    %c0_i32_0 = arith.constant 0 : i32
    %c0_i32_1 = arith.constant 0 : i32
    return %c0_i32, %c0_i32_0 : i32, i32
  }
  func.func @transform_8(%arg0: i32) -> (i32, i32) {
    %c0_i32 = arith.constant 0 : i32
    %c0_i32_0 = arith.constant 0 : i32
    %c0_i32_1 = arith.constant 0 : i32
    return %c0_i32, %c0_i32_0 : i32, i32
  }
  func.func @transform_9(%arg0: i32) -> (i32, i32) {
    %c0_i32 = arith.constant 0 : i32
    %c0_i32_0 = arith.constant 0 : i32
    return %arg0, %c0_i32 : i32, i32
  }
}

</mosaic_0001>

<bundles_post_ra>
// kernel: dqn_forward.2
= control target key start
LH: loop header
LB: loop body
LE: loop exit
PB: predicated region body
PF: predicated region fallthrough
CT: control target
= control target key end

     0   :  { %s1022_s12 = smov 0   ;;  %s1298_s0 = inlined_call_operand.vmem [shape: f32[16,2048], index: 0, kind: input, shape index: {}]   ;;  %s1299_s1 = inlined_call_operand.vmem [shape: bf16[256,32], index: 1, kind: input, shape index: {}]   ;;  %s1300_s2 = inlined_call_operand.vmem [shape: f32[1,32], index: 2, kind: input, shape index: {}]   ;;  %s1301_s3 = inlined_call_operand.vmem [shape: f32[16,256], index: 3, kind: output, shape index: {}]  }
   0x1 LB: > { %s758_s13 = sadd.s32 4294967295, %s997_s12   ;;  %p762_p0 = scmp.ge.s32.totalorder %s997_s12, 1  ;;  %s997_s12 = sphi %s1022_s12, %s13_s12  }
   0x2   : > { %p137_p1 = scmp.lt.s32.totalorder %s997_s12, 3 }
   0x4   : > { %p138_p2 = pnand %p762_p0, %p137_p1 }
   0x5   : > { %p161_p3 = scmp.lt.s32.totalorder (!%p138_p2), %s758_s13, 1  ;;  %s999_s4 = smov (!%p138_p2), 32  }
   0x6   : > { %141 = sbr.rel (%p138_p2) target bundleno = 461 (0x1cd), region = 32  ;;  %s1001_s5 = smov (!%p138_p2), 96  }
   0xb   : > { %v1033_v0 = vld [vmem:[%s1299_s1 + $0x78] sm:$0xff]   ;;  %v1045_v2 = vld [vmem:[%s1299_s1 + $0x70] sm:$0xff]   ;;  %v1059_v4 = vld [vmem:[%s1299_s1 + $0x68] sm:$0xff]   ;;  %s1303_s13 = smov (!%p161_p3, %s758_s13), 1  ;;  %vm352_vm0 = vcmask 261120   ;;  %vm403_vm1 = vcmask 523520  }
   0xc   : > { %v1038_v1 = vld [vmem:[%s1299_s1 + $0x38] sm:$0xff]   ;;  %788 = vmatprep.subr.bf16.mxu0 %v1033_v0  ;;  %810 = vmatprep.subr.bf16.mxu1 %v1033_v0  ;;  %v1052_v3 = vld [vmem:[%s1299_s1 + $0x30] sm:$0xff]   ;;  %v1068_v5 = vld [vmem:[%s1299_s1 + $0x28] sm:$0xff]   ;;  %s786_s28 = sshll.u32 %s1303_s13, 7  ;;  %s787_s27 = sshll.u32 %s1303_s13, 4  ;;  %vm454_vm2 = vcmask 785920  }
   0xd   : > { %789 = vmatpush3.bf16.msra.mxu0 %v1038_v1  ;;  %811 = vmatpush3.bf16.msra.mxu1 %v1038_v1  ;;  %v1075_v6 = vld [vmem:[%s1299_s1 + $0x60] sm:$0xff]   ;;  %v1090_v8 = vld [vmem:[%s1299_s1 + $0x58] sm:$0xff]   ;;  %s1095_s8 = scalar_lea.vmem %s1298_s0, %s786_s28  ;;  %v1109_v10 = vld [vmem:[%s1299_s1 + $0x50] sm:$0xff]   ;;  %s1273_s30 = scalar_lea.vmem %s1301_s3, %s787_s27  ;;  %vm505_vm3 = vcmask 1048320  }
   0xe   : > { %790 = vmatprep.subr.bf16.mxu0 %v1045_v2  ;;  %812 = vmatprep.subr.bf16.mxu1 %v1045_v2  ;;  %v1083_v7 = vld [vmem:[%s1299_s1 + $0x20] sm:$0xff]   ;;  %v1102_v9 = vld [vmem:[%s1299_s1 + $0x18] sm:$0xff]   ;;  %v206_v11 = vld [vmem:[%s1095_s8 + $0x8] sm:$0xff]  ;;  %s1000_s13 = smov 64  }
   0xf   : > { %v355_v12 = vld [vmem:[%s1095_s8 + $0x18] sm:$0xff]  ;;  %v208_v13 = vpack.c.bf16 %v206_v11, %v206_v11  ;;  %v1118_v15 = vld [vmem:[%s1299_s1 + $0x10] sm:$0xff]   ;;  %v1125_v16 = vld [vmem:[%s1299_s1 + $0x48] sm:$0xff]  }
  0x10   : > { %v357_v14 = vpack.c.bf16 %v355_v12, %v355_v12  ;;  %v1132_v17 = vld [vmem:[%s1299_s1 + $0x8] sm:$0xff]   ;;  %v1139_v18 = vld [vmem:[%s1299_s1 + $0x40] sm:$0xff]   ;;  %v354_v21 = vld [vmem:[%s1095_s8 + $0x10] sm:$0xff] }
  0x11   : > { %791 = vmatpush3.bf16.msra.mxu0 %v1052_v3  ;;  %813 = vmatpush3.bf16.msra.mxu1 %v1052_v3  ;;  %v1146_v19 = vld [vmem:[%s1299_s1] sm:$0xff]   ;;  %v356_v23 = vpack.c.bf16 %v354_v21, %v354_v21  ;;  %v406_v24 = vld [vmem:[%s1095_s8 + $0x28] sm:$0xff]  ;;  %v457_v25 = vld [vmem:[%s1095_s8 + $0x38] sm:$0xff] }
  0x12   : > { %792 = vmatprep.subr.bf16.mxu0 %v1059_v4  ;;  %814 = vmatprep.subr.bf16.mxu1 %v1059_v4  ;;  %v205_v20 = vld [vmem:[%s1095_s8] sm:$0xff]  ;;  %v408_v26 = vpack.c.bf16 %v406_v24, %v406_v24  ;;  %v459_v27 = vpack.c.bf16 %v457_v25, %v457_v25  ;;  %v456_v29 = vld [vmem:[%s1095_s8 + $0x30] sm:$0xff]  ;;  %v508_v32 = vld [vmem:[%s1095_s8 + $0x48] sm:$0xff] }
  0x13   : > { %343 = vmatprep.mubr.bf16.mxu0 %v208_v13  ;;  %390 = vmatprep.mubr.bf16.mxu1 %v357_v14  ;;  %v207_v22 = vpack.c.bf16 %v205_v20, %v205_v20  ;;  %v405_v28 = vld [vmem:[%s1095_s8 + $0x20] sm:$0xff]  ;;  %v458_v31 = vpack.c.bf16 %v456_v29, %v456_v29  ;;  %v554_v33 = vld [vmem:[%s1095_s8 + $0x58] sm:$0xff]  ;;  %v510_v34 = vpack.c.bf16 %v508_v32, %v508_v32  ;;  %v553_v37 = vld [vmem:[%s1095_s8 + $0x50] sm:$0xff] }
  0x14   : > { %v407_v30 = vpack.c.bf16 %v405_v28, %v405_v28  ;;  %v556_v35 = vpack.c.bf16 %v554_v33, %v554_v33  ;;  %v507_v36 = vld [vmem:[%s1095_s8 + $0x40] sm:$0xff]  ;;  %v555_v39 = vpack.c.bf16 %v553_v37, %v553_v37  ;;  %v604_v40 = vld [vmem:[%s1095_s8 + $0x68] sm:$0xff]  ;;  %v654_v41 = vld [vmem:[%s1095_s8 + $0x78] sm:$0xff] }
  0x15   : > { %793 = vmatpush3.bf16.msra.mxu0 %v1068_v5  ;;  %815 = vmatpush3.bf16.msra.mxu1 %v1068_v5  ;;  %v509_v38 = vpack.c.bf16 %v507_v36, %v507_v36  ;;  %v606_v42 = vpack.c.bf16 %v604_v40, %v604_v40  ;;  %v656_v43 = vpack.c.bf16 %v654_v41, %v654_v41  ;;  %v603_v44 = vld [vmem:[%s1095_s8 + $0x60] sm:$0xff]  ;;  %v653_v45 = vld [vmem:[%s1095_s8 + $0x70] sm:$0xff] }
  0x16   : > { %794 = vmatprep.subr.bf16.mxu0 %v1075_v6  ;;  %816 = vmatprep.subr.bf16.mxu1 %v1075_v6  ;;  %v605_v46 = vpack.c.bf16 %v603_v44, %v603_v44  ;;  %v655_v47 = vpack.c.bf16 %v653_v45, %v653_v45  ;;  %v1265_v50 = vld [vmem:[%s1300_s2] ss:$0 sm:$0xff] }
  0x19   : > { %795 = vmatpush3.bf16.msra.mxu0 %v1083_v7  ;;  %817 = vmatpush3.bf16.msra.mxu1 %v1083_v7 }
  0x1a   : > { %796 = vmatprep.subr.bf16.mxu0 %v1090_v8  ;;  %818 = vmatprep.subr.bf16.mxu1 %v1090_v8 }
  0x1d   : > { %797 = vmatpush3.bf16.msra.mxu0 %v1102_v9  ;;  %819 = vmatpush3.bf16.msra.mxu1 %v1102_v9 }
  0x1e   : > { %798 = vmatprep.subr.bf16.mxu0 %v1109_v10  ;;  %820 = vmatprep.subr.bf16.mxu1 %v1109_v10 }
  0x21   : > { %799 = vmatpush3.bf16.msra.mxu0 %v1118_v15  ;;  %821 = vmatpush3.bf16.msra.mxu1 %v1118_v15 }
  0x22   : > { %800 = vmatprep.subr.bf16.mxu0 %v1125_v16  ;;  %822 = vmatprep.subr.bf16.mxu1 %v1125_v16 }
  0x25   : > { %801 = vmatpush3.bf16.msra.mxu0 %v1132_v17  ;;  %823 = vmatpush3.bf16.msra.mxu1 %v1132_v17 }
  0x26   : > { %802 = vmatprep.subr.bf16.mxu0 %v1139_v18  ;;  %824 = vmatprep.subr.bf16.mxu1 %v1139_v18 }
  0x29   : > { %803 = vmatpush3.bf16.msra.mxu0 %v1146_v19  ;;  %825 = vmatpush3.bf16.msra.mxu1 %v1146_v19 }
  0x2a   : > { %832 = vmatprep.subr.bf16.mxu0 %v1033_v0  ;;  %854 = vmatprep.subr.bf16.mxu1 %v1033_v0 }
  0x2c   : > { %344 = vmatmul.mubr.bf16.vlgmr.msra.gmra.mxu0 %v207_v22  ;;  %391 = vmatmul.mubr.bf16.vlgmr.msra.gmra.mxu1 %v356_v23 }
  0x2d   : > { %833 = vmatpush3.bf16.msra.mxu0 %v1038_v1  ;;  %855 = vmatpush3.bf16.msra.mxu1 %v1038_v1 }
  0x2e   : > { %834 = vmatprep.subr.bf16.mxu0 %v1045_v2  ;;  %856 = vmatprep.subr.bf16.mxu1 %v1045_v2 }
  0x2f   : > { %441 = vmatprep.mubr.bf16.mxu0 %v408_v26  ;;  %492 = vmatprep.mubr.bf16.mxu1 %v459_v27 }
  0x31   : > { %835 = vmatpush3.bf16.msra.mxu0 %v1052_v3  ;;  %857 = vmatpush3.bf16.msra.mxu1 %v1052_v3 }
  0x32   : > { %836 = vmatprep.subr.bf16.mxu0 %v1059_v4  ;;  %858 = vmatprep.subr.bf16.mxu1 %v1059_v4 }
  0x35   : > { %837 = vmatpush3.bf16.msra.mxu0 %v1068_v5  ;;  %859 = vmatpush3.bf16.msra.mxu1 %v1068_v5 }
  0x36   : > { %838 = vmatprep.subr.bf16.mxu0 %v1075_v6  ;;  %860 = vmatprep.subr.bf16.mxu1 %v1075_v6 }
  0x39   : > { %839 = vmatpush3.bf16.msra.mxu0 %v1083_v7  ;;  %861 = vmatpush3.bf16.msra.mxu1 %v1083_v7 }
  0x3a   : > { %840 = vmatprep.subr.bf16.mxu0 %v1090_v8  ;;  %862 = vmatprep.subr.bf16.mxu1 %v1090_v8 }
  0x3d   : > { %841 = vmatpush3.bf16.msra.mxu0 %v1102_v9  ;;  %863 = vmatpush3.bf16.msra.mxu1 %v1102_v9 }
  0x3e   : > { %842 = vmatprep.subr.bf16.mxu0 %v1109_v10  ;;  %864 = vmatprep.subr.bf16.mxu1 %v1109_v10 }
  0x41   : > { %843 = vmatpush3.bf16.msra.mxu0 %v1118_v15  ;;  %865 = vmatpush3.bf16.msra.mxu1 %v1118_v15 }
  0x42   : > { %844 = vmatprep.subr.bf16.mxu0 %v1125_v16  ;;  %866 = vmatprep.subr.bf16.mxu1 %v1125_v16 }
  0x45   : > { %845 = vmatpush3.bf16.msra.mxu0 %v1132_v17  ;;  %867 = vmatpush3.bf16.msra.mxu1 %v1132_v17 }
  0x46   : > { %846 = vmatprep.subr.bf16.mxu0 %v1139_v18  ;;  %868 = vmatprep.subr.bf16.mxu1 %v1139_v18 }
  0x49   : > { %847 = vmatpush3.bf16.msra.mxu0 %v1146_v19  ;;  %869 = vmatpush3.bf16.msra.mxu1 %v1146_v19 }
  0x4a   : > { %876 = vmatprep.subr.bf16.mxu0 %v1033_v0  ;;  %898 = vmatprep.subr.bf16.mxu1 %v1033_v0 }
  0x4c   : > { %442 = vmatmul.mubr.bf16.vlgmr.msra.gmra.mxu0 %v407_v30  ;;  %493 = vmatmul.mubr.bf16.vlgmr.msra.gmra.mxu1 %v458_v31 }
  0x4d   : > { %877 = vmatpush3.bf16.msra.mxu0 %v1038_v1  ;;  %899 = vmatpush3.bf16.msra.mxu1 %v1038_v1 }
  0x4e   : > { %878 = vmatprep.subr.bf16.mxu0 %v1045_v2  ;;  %900 = vmatprep.subr.bf16.mxu1 %v1045_v2 }
  0x4f   : > { %543 = vmatprep.mubr.bf16.mxu0 %v510_v34  ;;  %589 = vmatprep.mubr.bf16.mxu1 %v556_v35 }
  0x51   : > { %879 = vmatpush3.bf16.msra.mxu0 %v1052_v3  ;;  %901 = vmatpush3.bf16.msra.mxu1 %v1052_v3 }
  0x52   : > { %880 = vmatprep.subr.bf16.mxu0 %v1059_v4  ;;  %902 = vmatprep.subr.bf16.mxu1 %v1059_v4 }
  0x55   : > { %881 = vmatpush3.bf16.msra.mxu0 %v1068_v5  ;;  %903 = vmatpush3.bf16.msra.mxu1 %v1068_v5 }
  0x56   : > { %882 = vmatprep.subr.bf16.mxu0 %v1075_v6  ;;  %904 = vmatprep.subr.bf16.mxu1 %v1075_v6 }
  0x59   : > { %883 = vmatpush3.bf16.msra.mxu0 %v1083_v7  ;;  %905 = vmatpush3.bf16.msra.mxu1 %v1083_v7 }
  0x5a   : > { %884 = vmatprep.subr.bf16.mxu0 %v1090_v8  ;;  %906 = vmatprep.subr.bf16.mxu1 %v1090_v8 }
  0x5d   : > { %885 = vmatpush3.bf16.msra.mxu0 %v1102_v9  ;;  %907 = vmatpush3.bf16.msra.mxu1 %v1102_v9 }
  0x5e   : > { %886 = vmatprep.subr.bf16.mxu0 %v1109_v10  ;;  %908 = vmatprep.subr.bf16.mxu1 %v1109_v10 }
  0x61   : > { %887 = vmatpush3.bf16.msra.mxu0 %v1118_v15  ;;  %909 = vmatpush3.bf16.msra.mxu1 %v1118_v15 }
  0x62   : > { %888 = vmatprep.subr.bf16.mxu0 %v1125_v16  ;;  %910 = vmatprep.subr.bf16.mxu1 %v1125_v16 }
  0x65   : > { %889 = vmatpush3.bf16.msra.mxu0 %v1132_v17  ;;  %911 = vmatpush3.bf16.msra.mxu1 %v1132_v17 }
  0x66   : > { %890 = vmatprep.subr.bf16.mxu0 %v1139_v18  ;;  %912 = vmatprep.subr.bf16.mxu1 %v1139_v18 }
  0x69   : > { %891 = vmatpush3.bf16.msra.mxu0 %v1146_v19  ;;  %913 = vmatpush3.bf16.msra.mxu1 %v1146_v19 }
  0x6a   : > { %920 = vmatprep.subr.bf16.mxu0 %v1033_v0  ;;  %942 = vmatprep.subr.bf16.mxu1 %v1033_v0 }
  0x6c   : > { %544 = vmatmul.mubr.bf16.vlgmr.msra.gmra.mxu0 %v509_v38  ;;  %590 = vmatmul.mubr.bf16.vlgmr.msra.gmra.mxu1 %v555_v39 }
  0x6d   : > { %921 = vmatpush3.bf16.msra.mxu0 %v1038_v1  ;;  %943 = vmatpush3.bf16.msra.mxu1 %v1038_v1 }
  0x6e   : > { %922 = vmatprep.subr.bf16.mxu0 %v1045_v2  ;;  %944 = vmatprep.subr.bf16.mxu1 %v1045_v2 }
  0x6f   : > { %639 = vmatprep.mubr.bf16.mxu0 %v606_v42  ;;  %689 = vmatprep.mubr.bf16.mxu1 %v656_v43 }
  0x71   : > { %923 = vmatpush3.bf16.msra.mxu0 %v1052_v3  ;;  %945 = vmatpush3.bf16.msra.mxu1 %v1052_v3 }
  0x72   : > { %924 = vmatprep.subr.bf16.mxu0 %v1059_v4  ;;  %946 = vmatprep.subr.bf16.mxu1 %v1059_v4 }
  0x75   : > { %925 = vmatpush3.bf16.msra.mxu0 %v1068_v5  ;;  %947 = vmatpush3.bf16.msra.mxu1 %v1068_v5 }
  0x76   : > { %926 = vmatprep.subr.bf16.mxu0 %v1075_v6  ;;  %948 = vmatprep.subr.bf16.mxu1 %v1075_v6 }
  0x79   : > { %927 = vmatpush3.bf16.msra.mxu0 %v1083_v7  ;;  %949 = vmatpush3.bf16.msra.mxu1 %v1083_v7 }
  0x7a   : > { %928 = vmatprep.subr.bf16.mxu0 %v1090_v8  ;;  %950 = vmatprep.subr.bf16.mxu1 %v1090_v8 }
  0x7d   : > { %929 = vmatpush3.bf16.msra.mxu0 %v1102_v9  ;;  %951 = vmatpush3.bf16.msra.mxu1 %v1102_v9 }
  0x7e   : > { %930 = vmatprep.subr.bf16.mxu0 %v1109_v10  ;;  %952 = vmatprep.subr.bf16.mxu1 %v1109_v10 }
  0x81   : > { %931 = vmatpush3.bf16.msra.mxu0 %v1118_v15  ;;  %953 = vmatpush3.bf16.msra.mxu1 %v1118_v15 }
  0x82   : > { %932 = vmatprep.subr.bf16.mxu0 %v1125_v16  ;;  %954 = vmatprep.subr.bf16.mxu1 %v1125_v16 }
  0x85   : > { %933 = vmatpush3.bf16.msra.mxu0 %v1132_v17  ;;  %955 = vmatpush3.bf16.msra.mxu1 %v1132_v17 }
  0x86   : > { %934 = vmatprep.subr.bf16.mxu0 %v1139_v18  ;;  %956 = vmatprep.subr.bf16.mxu1 %v1139_v18 }
  0x89   : > { %935 = vmatpush3.bf16.msra.mxu0 %v1146_v19  ;;  %957 = vmatpush3.bf16.msra.mxu1 %v1146_v19 }
  0x8c   : > { %640 = vmatmul.mubr.bf16.vlgmr.msra.gmra.mxu0 %v605_v46  ;;  %690 = vmatmul.mubr.bf16.vlgmr.msra.gmra.mxu1 %v655_v47 }
  0xec   : > { %v804_v48 = vpop.f32.mrf.mxu0  ;;  %v826_v49 = vpop.f32.mrf.mxu1 }
  0xee   : > { %v805_v51 = vpop.f32.mrf.mxu0  ;;  %v827_v52 = vpop.f32.mrf.mxu1 }
  0xef   : > { %v806_v53 = vadd.f32 %v805_v51, %v804_v48  ;;  %v828_v54 = vadd.f32 %v827_v52, %v826_v49 }
  0xf0   : > { %v807_v55 = vpop.f32.mrf.mxu0  ;;  %v829_v56 = vpop.f32.mrf.mxu1 }
  0xf1   : > { %v346_v57 = vadd.f32 %v806_v53, %v1265_v50  ;;  %v393_v58 = vadd.f32 %v828_v54, %v1265_v50 }
  0xf2   : > { %v808_v59 = vpop.f32.mrf.mxu0  ;;  %v830_v60 = vpop.f32.mrf.mxu1 }
  0xf3   : > { %v351_v61 = vmax.f32 %v346_v57, 0.0  ;;  %v398_v62 = vmax.f32 %v393_v58, 0.0 }
  0xf5   : > { %400 = vrot.lane.b32.xlu0 %v398_v62, %s999_s4  ;;  %353 = vst.msk [vmem:[%s1273_s30] sm:$0xff] %vm352_vm0, %v351_v61 }
 0x10c   : > { %v848_v63 = vpop.f32.mrf.mxu0  ;;  %v870_v0 = vpop.f32.mrf.mxu1 }
 0x10e   : > { %v849_v1 = vpop.f32.mrf.mxu0  ;;  %v871_v2 = vpop.f32.mrf.mxu1 }
 0x10f   : > { %v850_v3 = vadd.f32 %v849_v1, %v848_v63  ;;  %v872_v14 = vadd.f32 %v871_v2, %v870_v0 }
 0x110   : > { %v851_v4 = vpop.f32.mrf.mxu0  ;;  %v873_v5 = vpop.f32.mrf.mxu1 }
 0x111   : > { %v444_v6 = vadd.f32 %v850_v3, %v1265_v50  ;;  %v495_v23 = vadd.f32 %v872_v14, %v1265_v50 }
 0x112   : > { %v852_v7 = vpop.f32.mrf.mxu0  ;;  %v874_v8 = vpop.f32.mrf.mxu1 }
 0x113   : > { %v449_v9 = vmax.f32 %v444_v6, 0.0  ;;  %v500_v26 = vmax.f32 %v495_v23, 0.0 }
 0x115   : > { %451 = vrot.lane.b32.xlu1 %v449_v9, %s1000_s13 }
 0x12c   : > { %v892_v10 = vpop.f32.mrf.mxu0  ;;  %v914_v11 = vpop.f32.mrf.mxu1 }
 0x12e   : > { %v893_v12 = vpop.f32.mrf.mxu0  ;;  %v915_v13 = vpop.f32.mrf.mxu1 }
 0x12f   : > { %v894_v15 = vadd.f32 %v893_v12, %v892_v10  ;;  %v916_v16 = vadd.f32 %v915_v13, %v914_v11 }
 0x130   : > { %v895_v17 = vpop.f32.mrf.mxu0  ;;  %v917_v18 = vpop.f32.mrf.mxu1 }
 0x131   : > { %v546_v19 = vadd.f32 %v894_v15, %v1265_v50  ;;  %v592_v20 = vadd.f32 %v916_v16, %v1265_v50 }
 0x132   : > { %v896_v21 = vpop.f32.mrf.mxu0  ;;  %v918_v22 = vpop.f32.mrf.mxu1 }
 0x133   : > { %v551_v24 = vmax.f32 %v546_v19, 0.0  ;;  %v597_v25 = vmax.f32 %v592_v20, 0.0 }
 0x135   : > { %599 = vrot.lane.b32.xlu0 %v597_v25, %s999_s4  ;;  %552 = vst.msk [vmem:[%s1273_s30 + $0x8] sm:$0xff] %vm352_vm0, %v551_v24 }
 0x139   : > { %502 = vrot.lane.b32.xlu0 %v500_v26, %s1001_s5 }
 0x14c   : > { %v936_v27 = vpop.f32.mrf.mxu0  ;;  %v958_v28 = vpop.f32.mrf.mxu1 }
 0x14e   : > { %v937_v29 = vpop.f32.mrf.mxu0  ;;  %v959_v30 = vpop.f32.mrf.mxu1 }
 0x14f   : > { %v938_v31 = vadd.f32 %v937_v29, %v936_v27  ;;  %v960_v32 = vadd.f32 %v959_v30, %v958_v28 }
 0x150   : > { %v939_v33 = vpop.f32.mrf.mxu0  ;;  %v961_v34 = vpop.f32.mrf.mxu1 }
 0x151   : > { %v642_v35 = vadd.f32 %v938_v31, %v1265_v50  ;;  %v692_v39 = vadd.f32 %v960_v32, %v1265_v50 }
 0x152   : > { %v940_v36 = vpop.f32.mrf.mxu0  ;;  %v962_v37 = vpop.f32.mrf.mxu1 }
 0x153   : > { %v647_v38 = vmax.f32 %v642_v35, 0.0  ;;  %v697_v40 = vmax.f32 %v692_v39, 0.0 }
 0x155   : > { %649 = vrot.lane.b32.xlu1 %v647_v38, %s1000_s13 }
 0x159   : > { %699 = vrot.lane.b32.xlu1 %v697_v40, %s1001_s5 }
 0x167   : > { %v401_v41 = vpop.permute.xlu0 %400 }
 0x168   : > { %404 = vst.msk [vmem:[%s1273_s30] sm:$0xff] %vm403_vm1, %v401_v41 }
 0x187   : > { %v452_v42 = vpop.permute.xlu1 %451 }
 0x188   : > { %455 = vst.msk [vmem:[%s1273_s30] sm:$0xff] %vm454_vm2, %v452_v42 }
 0x1a7   : > { %v600_v43 = vpop.permute.xlu0 %599 }
 0x1a8   : > { %602 = vst.msk [vmem:[%s1273_s30 + $0x8] sm:$0xff] %vm403_vm1, %v600_v43 }
 0x1ab   : > { %v503_v44 = vpop.permute.xlu0 %502 }
 0x1ac   : > { %506 = vst.msk [vmem:[%s1273_s30] sm:$0xff] %vm505_vm3, %v503_v44 }
 0x1c7   : > { %v650_v45 = vpop.permute.xlu1 %649 }
 0x1c8   : > { %652 = vst.msk [vmem:[%s1273_s30 + $0x8] sm:$0xff] %vm454_vm2, %v650_v45 }
 0x1cb   : > { %v700_v46 = vpop.permute.xlu1 %699 }
 0x1cc   : > { %702 = vst.msk [vmem:[%s1273_s30 + $0x8] sm:$0xff] %vm505_vm3, %v700_v46 }
 0x1cd PF: > { %s13_s12 = sadd.s32 1, %s997_s12  }
 0x1ce   : > { %p10_p4 = scmp.ge.s32.totalorder %s13_s12, 4  }
 0x1d0   :  { %12 = sbr.rel (!%p10_p4) target bundleno = 1 (0x1), region = 62 }

// kernel: dqn_forward.3
= control target key start
LH: loop header
LB: loop body
LE: loop exit
PB: predicated region body
PF: predicated region fallthrough
CT: control target
= control target key end

     0   :  { %v118_v28 = vlaneseq  ;;  %v3499_v35 = vmov 1966171168   ;;  %v3500_v51 = vmov 0.0   ;;  %s4576_s0 = inlined_call_operand.vmem [shape: bf16[9,2,512], index: 0, kind: input, shape index: {}]   ;;  %s4577_s1 = inlined_call_operand.vmem [shape: bf16[512,64], index: 1, kind: input, shape index: {}]   ;;  %s4578_s2 = inlined_call_operand.vmem [shape: f32[1,64], index: 2, kind: input, shape index: {}]   ;;  %s4579_s3 = inlined_call_operand.vmem [shape: bf16[576,64], index: 3, kind: input, shape index: {}]   ;;  %s4580_s4 = inlined_call_operand.vmem [shape: f32[1,64], index: 4, kind: input, shape index: {}]   ;;  %s4581_s5 = inlined_call_operand.vmem [shape: bf16[64,512], index: 5, kind: input, shape index: {}]   ;;  %s4582_s6 = inlined_call_operand.vmem [shape: f32[1,512], index: 6, kind: input, shape index: {}]   ;;  %s4583_s7 = inlined_call_operand.vmem [shape: bf16[512,128], index: 7, kind: input, shape index: {}]   ;;  %s4584_s8 = inlined_call_operand.vmem [shape: f32[1,128], index: 8, kind: input, shape index: {}]   ;;  %s4585_s9 = inlined_call_operand.hbm [shape: f32[2,128], index: 9, kind: output, shape index: {}]  }
   0x1   :  { %v3557_v0 = vld [vmem:[%s4577_s1 + $0x78] sm:$0xff]   ;;  %v3580_v4 = vld [vmem:[%s4577_s1 + $0x70] sm:$0xff]   ;;  %v3604_v8 = vld [vmem:[%s4577_s1 + $0x68] sm:$0xff]   ;;  %v116_v36 = vunpack.c.l.s4 %v3499_v35 }
   0x2   :  { %v3562_v1 = vld [vmem:[%s4577_s1 + $0xf8] sm:$0xff]   ;;  %2722 = vmatprep.subr.bf16.mxu0 %v3557_v0  ;;  %v3586_v5 = vld [vmem:[%s4577_s1 + $0xf0] sm:$0xff]   ;;  %v3610_v9 = vld [vmem:[%s4577_s1 + $0xe8] sm:$0xff]   ;;  %v3744_v33 = vshrl.u32 %v118_v28, 7 }
   0x3   :  { %v3568_v2 = vld [vmem:[%s4577_s1 + $0x38] sm:$0xff]   ;;  %2744 = vmatprep.subr.bf16.mxu1 %v3562_v1  ;;  %v3592_v6 = vld [vmem:[%s4577_s1 + $0x30] sm:$0xff]   ;;  %v3616_v10 = vld [vmem:[%s4577_s1 + $0x28] sm:$0xff]   ;;  %v117_v39 = vunpack.c.0.s8 %v116_v36 }
   0x4   :  { %v3574_v3 = vld [vmem:[%s4577_s1 + $0xb8] sm:$0xff]   ;;  %2723 = vmatpush3.bf16.msra.mxu0 %v3568_v2  ;;  %v3598_v7 = vld [vmem:[%s4577_s1 + $0xb0] sm:$0xff]   ;;  %v3622_v11 = vld [vmem:[%s4577_s1 + $0xa8] sm:$0xff]  }
   0x5   :  { %2745 = vmatpush3.bf16.msra.mxu1 %v3574_v3  ;;  %2724 = vmatprep.subr.bf16.mxu0 %v3580_v4  ;;  %v3628_v12 = vld [vmem:[%s4577_s1 + $0x60] sm:$0xff]   ;;  %v3652_v16 = vld [vmem:[%s4577_s1 + $0x58] sm:$0xff]   ;;  %v3676_v20 = vld [vmem:[%s4577_s1 + $0x50] sm:$0xff]   ;;  %v3757_v41 = vsub.s32 %v117_v39, %v3744_v33 }
   0x6   :  { %2746 = vmatprep.subr.bf16.mxu1 %v3586_v5  ;;  %v3634_v13 = vld [vmem:[%s4577_s1 + $0xe0] sm:$0xff]   ;;  %v3658_v17 = vld [vmem:[%s4577_s1 + $0xd8] sm:$0xff]   ;;  %v3682_v21 = vld [vmem:[%s4577_s1 + $0xd0] sm:$0xff]  }
   0x7   :  { %v3640_v14 = vld [vmem:[%s4577_s1 + $0x20] sm:$0xff]   ;;  %v3664_v18 = vld [vmem:[%s4577_s1 + $0x18] sm:$0xff]   ;;  %v3688_v22 = vld [vmem:[%s4577_s1 + $0x10] sm:$0xff]  }
   0x8   :  { %2725 = vmatpush3.bf16.msra.mxu0 %v3592_v6  ;;  %v3646_v15 = vld [vmem:[%s4577_s1 + $0xa0] sm:$0xff]   ;;  %v3670_v19 = vld [vmem:[%s4577_s1 + $0x98] sm:$0xff]   ;;  %v3694_v23 = vld [vmem:[%s4577_s1 + $0x90] sm:$0xff]  }
   0x9   :  { %2747 = vmatpush3.bf16.msra.mxu1 %v3598_v7  ;;  %2726 = vmatprep.subr.bf16.mxu0 %v3604_v8  ;;  %v3700_v24 = vld [vmem:[%s4577_s1 + $0x48] sm:$0xff]   ;;  %v3724_v29 = vld [vmem:[%s4577_s1 + $0x40] sm:$0xff]   ;;  %v3352_v49 = vld [vmem:[%s4579_s3 + $0x18] sm:$0xff]  }
   0xa   :  { %2748 = vmatprep.subr.bf16.mxu1 %v3610_v9  ;;  %v3706_v25 = vld [vmem:[%s4577_s1 + $0xc8] sm:$0xff]   ;;  %v3730_v30 = vld [vmem:[%s4577_s1 + $0xc0] sm:$0xff]  }
   0xb   :  { %v3712_v26 = vld [vmem:[%s4577_s1 + $0x8] sm:$0xff]   ;;  %v3736_v31 = vld [vmem:[%s4577_s1] sm:$0xff]  }
   0xc   :  { %2727 = vmatpush3.bf16.msra.mxu0 %v3616_v10  ;;  %v3718_v27 = vld [vmem:[%s4577_s1 + $0x88] sm:$0xff]   ;;  %v3742_v32 = vld [vmem:[%s4577_s1 + $0x80] sm:$0xff]  }
   0xd   :  { %2749 = vmatpush3.bf16.msra.mxu1 %v3622_v11  ;;  %2728 = vmatprep.subr.bf16.mxu0 %v3628_v12  ;;  %v2576_v34 = vld.sshfl [vmem:[%s4576_s0] sm:$0x33 pattern:$0x75316420] }
   0xe   :  { %2750 = vmatprep.subr.bf16.mxu1 %v3634_v13  ;;  %v2610_v37 = vld.sshfl [vmem:[%s4576_s0 + $0x4] sm:$0x33 pattern:$0x75316420]  ;;  %v114_v38 = vcombine.high %v2576_v34, %v2576_v34  ;;  %v121_v43 = vrot.slane %v2576_v34, %v3757_v41 }
   0xf   :  { %v427_v40 = vcombine.high %v2610_v37, %v2610_v37  ;;  %v434_v48 = vrot.slane %v2610_v37, %v3757_v41 }
  0x10   :  { %2729 = vmatpush3.bf16.msra.mxu0 %v3640_v14  ;;  %v128_v42 = vrot.slane %v114_v38, %v3757_v41  ;;  %v129_v46 = vcombine.high %v121_v43, %v121_v43 }
  0x11   :  { %2751 = vmatpush3.bf16.msra.mxu1 %v3646_v15  ;;  %2730 = vmatprep.subr.bf16.mxu0 %v3652_v16  ;;  %v441_v44 = vrot.slane %v427_v40, %v3757_v41  ;;  %v442_v50 = vcombine.high %v434_v48, %v434_v48 }
  0x12   :  { %2752 = vmatprep.subr.bf16.mxu1 %v3658_v17  ;;  %359 = vmatprep.mubr.bf16.mxu0 %v128_v42  ;;  %v130_v45 = vcombine.high %v128_v42, %v128_v42 }
  0x13   :  { %v443_v47 = vcombine.high %v441_v44, %v441_v44 }
  0x14   :  { %2731 = vmatpush3.bf16.msra.mxu0 %v3664_v18  ;;  %399 = vmatprep.mubr.bf16.mxu1 %v130_v45 }
  0x15   :  { %2753 = vmatpush3.bf16.msra.mxu1 %v3670_v19  ;;  %2732 = vmatprep.subr.bf16.mxu0 %v3676_v20 }
  0x16   :  { %2754 = vmatprep.subr.bf16.mxu1 %v3682_v21 }
  0x18   :  { %2733 = vmatpush3.bf16.msra.mxu0 %v3688_v22 }
  0x19   :  { %2755 = vmatpush3.bf16.msra.mxu1 %v3694_v23  ;;  %2734 = vmatprep.subr.bf16.mxu0 %v3700_v24 }
  0x1a   :  { %2756 = vmatprep.subr.bf16.mxu1 %v3706_v25 }
  0x1c   :  { %2735 = vmatpush3.bf16.msra.mxu0 %v3712_v26 }
  0x1d   :  { %2757 = vmatpush3.bf16.msra.mxu1 %v3718_v27  ;;  %2736 = vmatprep.subr.bf16.mxu0 %v3724_v29 }
  0x1e   :  { %2758 = vmatprep.subr.bf16.mxu1 %v3730_v30 }
  0x20   :  { %2737 = vmatpush3.bf16.msra.mxu0 %v3736_v31 }
  0x21   :  { %2759 = vmatpush3.bf16.msra.mxu1 %v3742_v32  ;;  %2766 = vmatprep.subr.bf16.mxu0 %v3557_v0 }
  0x22   :  { %2788 = vmatprep.subr.bf16.mxu1 %v3562_v1 }
  0x23   :  { %360 = vmatmul.mubr.bf16.vlgmr.msra.gmra.mxu0 %v121_v43 }
  0x24   :  { %2767 = vmatpush3.bf16.msra.mxu0 %v3568_v2  ;;  %400 = vmatmul.mubr.bf16.vlgmr.msra.gmra.mxu1 %v129_v46 }
  0x25   :  { %2768 = vmatprep.subr.bf16.mxu0 %v3580_v4  ;;  %2789 = vmatpush3.bf16.msra.mxu1 %v3574_v3 }
  0x26   :  { %480 = vmatprep.mubr.bf16.mxu0 %v441_v44  ;;  %2790 = vmatprep.subr.bf16.mxu1 %v3586_v5 }
  0x27   :  { %520 = vmatprep.mubr.bf16.mxu1 %v443_v47 }
  0x28   :  { %2769 = vmatpush3.bf16.msra.mxu0 %v3592_v6 }
  0x29   :  { %2770 = vmatprep.subr.bf16.mxu0 %v3604_v8  ;;  %2791 = vmatpush3.bf16.msra.mxu1 %v3598_v7 }
  0x2a   :  { %2792 = vmatprep.subr.bf16.mxu1 %v3610_v9 }
  0x2c   :  { %2771 = vmatpush3.bf16.msra.mxu0 %v3616_v10 }
  0x2d   :  { %2772 = vmatprep.subr.bf16.mxu0 %v3628_v12  ;;  %2793 = vmatpush3.bf16.msra.mxu1 %v3622_v11 }
  0x2e   :  { %2794 = vmatprep.subr.bf16.mxu1 %v3634_v13 }
  0x30   :  { %2773 = vmatpush3.bf16.msra.mxu0 %v3640_v14 }
  0x31   :  { %2774 = vmatprep.subr.bf16.mxu0 %v3652_v16  ;;  %2795 = vmatpush3.bf16.msra.mxu1 %v3646_v15 }
  0x32   :  { %2796 = vmatprep.subr.bf16.mxu1 %v3658_v17 }
  0x34   :  { %2775 = vmatpush3.bf16.msra.mxu0 %v3664_v18 }
  0x35   :  { %2776 = vmatprep.subr.bf16.mxu0 %v3676_v20  ;;  %2797 = vmatpush3.bf16.msra.mxu1 %v3670_v19 }
  0x36   :  { %2798 = vmatprep.subr.bf16.mxu1 %v3682_v21 }
  0x38   :  { %2777 = vmatpush3.bf16.msra.mxu0 %v3688_v22 }
  0x39   :  { %2778 = vmatprep.subr.bf16.mxu0 %v3700_v24  ;;  %2799 = vmatpush3.bf16.msra.mxu1 %v3694_v23 }
  0x3a   :  { %2800 = vmatprep.subr.bf16.mxu1 %v3706_v25 }
  0x3c   :  { %2779 = vmatpush3.bf16.msra.mxu0 %v3712_v26 }
  0x3d   :  { %2780 = vmatprep.subr.bf16.mxu0 %v3724_v29  ;;  %2801 = vmatpush3.bf16.msra.mxu1 %v3718_v27 }
  0x3e   :  { %2802 = vmatprep.subr.bf16.mxu1 %v3730_v30 }
  0x40   :  { %2781 = vmatpush3.bf16.msra.mxu0 %v3736_v31 }
  0x41   :  { %3207 = vmatprep.subr.bf16.mxu0 %v3500_v51  ;;  %2803 = vmatpush3.bf16.msra.mxu1 %v3742_v32 }
  0x42   :  { %3219 = vmatprep.subr.bf16.mxu1 %v3500_v51 }
  0x43   :  { %481 = vmatmul.mubr.bf16.vlgmr.msra.gmra.mxu0 %v434_v48 }
  0x44   :  { %521 = vmatmul.mubr.bf16.vlgmr.msra.gmra.mxu1 %v442_v50 }
  0x45   :  { %3220 = vmatpush3.bf16.msra.mxu1 %v3352_v49 }
  0x46   :  { %3221 = vmatprep.subr.bf16.mxu1 %v3500_v51 }
  0x47   :  { %14 = vsyncpa [#allocation3], 0  ;;  %v3353_v52 = vld [vmem:[%s4579_s3 + $0x10] sm:$0xff]   ;;  %v3354_v53 = vld [vmem:[%s4579_s3 + $0x8] sm:$0xff]   ;;  %vm3501_vm0 = vmmov 0   ;;  %vm562_vm1 = vcmask 523264  }
  0x48   :  { %v3355_v54 = vld [vmem:[%s4579_s3] sm:$0xff]   ;;  %3227 = vmatprep.mubr.msk.bf16.mxu1 %vm3501_vm0, %v3500_v51  ;;  %v3356_v55 = vld [vmem:[%s4579_s3 + $0x38] sm:$0xff]   ;;  %3215 = vmatprep.mubr.msk.bf16.mxu0 %vm3501_vm0, %v3500_v51  ;;  %v3357_v56 = vld [vmem:[%s4579_s3 + $0x30] sm:$0xff]   ;;  %s3503_s12 = smov [#allocation2]  }
  0x49   :  { %3222 = vmatpush3.bf16.msra.mxu1 %v3353_v52  ;;  %3208 = vmatpush3.bf16.msra.mxu0 %v3356_v55  ;;  %v3358_v57 = vld [vmem:[%s4579_s3 + $0x28] sm:$0xff]   ;;  %v3359_v58 = vld [vmem:[%s4579_s3 + $0x20] sm:$0xff]   ;;  %s2567_s13 = sshll.u32 %s3503_s12, 4  ;;  %s2568_s13 = int_to_ptr.vmem [resolvable:$true] %s2567_s13 }
  0x4a   :  { %3223 = vmatprep.subr.bf16.mxu1 %v3500_v51  ;;  %3209 = vmatprep.subr.bf16.mxu0 %v3500_v51  ;;  %v2622_v59 = vld.sshfl [vmem:[%s4576_s0 + $0x8] sm:$0x33 pattern:$0x75316420]  ;;  %v3837_v62 = vld [vmem:[%s4578_s2] ss:$0 sm:$0xff]  ;;  %p3482_p1 = scmp.lt.s32.totalorder %s2568_s13, %s2568_s13 }
  0x4b   :  { %v683_v28 = vcombine.high %v2622_v59, %v2622_v59  ;;  %s3477_s14 = scalar_lea.vmem %s2568_s13, 32 }
  0x4c   :  { %p3478_p0 = scmp.ne.s32.totalorder %s2568_s13, %s3477_s14  ;;  %p3483_p2 = scmp.lt.s32.totalorder %s3477_s14, %s3477_s14 }
  0x4d   :  { %3224 = vmatpush3.bf16.msra.mxu1 %v3354_v53  ;;  %3210 = vmatpush3.bf16.msra.mxu0 %v3357_v56  ;;  %v697_v42 = vrot.slane %v683_v28, %v3757_v41 }
  0x4e   :  { %3225 = vmatprep.subr.bf16.mxu1 %v3500_v51  ;;  %3211 = vmatprep.subr.bf16.mxu0 %v3500_v51  ;;  %p3484_p3 = por %p3483_p2, %p3482_p1 }
  0x4f   :  { %v699_v46 = vcombine.high %v697_v42, %v697_v42 }
  0x50   :  { %p3485_p4 = pnand %p3484_p3, %p3478_p0 }
  0x51   :  { %3226 = vmatpush3.bf16.msra.mxu1 %v3355_v54  ;;  %3212 = vmatpush3.bf16.msra.mxu0 %v3358_v57  ;;  %v690_v57 = vrot.slane %v2622_v59, %v3757_v41  ;;  %v3362_v59 = vld [vmem:[%s4579_s3 + $0x48] sm:$0xff]  }
  0x52   :  { %2842 = vmatprep.subr.bf16.mxu1 %v3562_v1  ;;  %3213 = vmatprep.subr.bf16.mxu0 %v3500_v51 }
  0x55   :  { %3214 = vmatpush3.bf16.msra.mxu0 %v3359_v58 }
  0x56   :  { %2820 = vmatprep.subr.bf16.mxu0 %v3557_v0 }
  0xe3   :  { %v2738_v60 = vpop.f32.mrf.mxu0 }
  0xe4   :  { %v2760_v61 = vpop.f32.mrf.mxu1 }
  0xe5   :  { %v2739_v63 = vpop.f32.mrf.mxu0 }
  0xe6   :  { %v2740_v34 = vadd.f32 %v2739_v63, %v2738_v60  ;;  %v2761_v35 = vpop.f32.mrf.mxu1 }
  0xe7   :  { %v2741_v36 = vpop.f32.mrf.mxu0  ;;  %v2762_v38 = vadd.f32 %v2761_v35, %v2760_v61 }
  0xe8   :  { %v362_v37 = vadd.f32 %v2740_v34, %v3837_v62  ;;  %v2763_v39 = vpop.f32.mrf.mxu1  ;;  %v698_v34 = vcombine.high %v690_v57, %v690_v57  ;;  %v3363_v36 = vld [vmem:[%s4579_s3 + $0x40] sm:$0xff]  }
  0xe9   :  { %v2742_v40 = vpop.f32.mrf.mxu0 }
  0xea   :  { %v402_v43 = vadd.f32 %v2762_v38, %v362_v37  ;;  %v2764_v44 = vpop.f32.mrf.mxu1  ;;  %v2629_v37 = vld.sshfl [vmem:[%s4576_s0 + $0xc] sm:$0x33 pattern:$0x75316420] }
  0xeb   :  { %v872_v38 = vcombine.high %v2629_v37, %v2629_v37  ;;  %v879_v40 = vrot.slane %v2629_v37, %v3757_v41 }
  0xec   :  { %v407_v45 = vmax.f32 %v402_v43, 0.0 }
  0xed   :  { %v886_v39 = vrot.slane %v872_v38, %v3757_v41 }
  0xee   :  { %v408_v47 = vpack.c.bf16 %v407_v45, %v407_v45 }
  0xf0   :  { %3228 = vmatmul.mubr.msk.bf16.vlgmr.msra.gmra.mxu1 %vm562_vm1, %v408_v47 }
  0xf1   :  { %2843 = vmatpush3.bf16.msra.mxu1 %v3574_v3  ;;  %776 = vmatprep.mubr.bf16.mxu1 %v699_v46 }
  0xf2   :  { %2844 = vmatprep.subr.bf16.mxu1 %v3586_v5 }
  0xf5   :  { %2845 = vmatpush3.bf16.msra.mxu1 %v3598_v7 }
  0xf6   :  { %2846 = vmatprep.subr.bf16.mxu1 %v3610_v9 }
  0xf9   :  { %2847 = vmatpush3.bf16.msra.mxu1 %v3622_v11 }
  0xfa   :  { %2848 = vmatprep.subr.bf16.mxu1 %v3634_v13 }
  0xfd   :  { %2849 = vmatpush3.bf16.msra.mxu1 %v3646_v15 }
  0xfe   :  { %2850 = vmatprep.subr.bf16.mxu1 %v3658_v17 }
 0x101   :  { %2851 = vmatpush3.bf16.msra.mxu1 %v3670_v19 }
 0x102   :  { %2852 = vmatprep.subr.bf16.mxu1 %v3682_v21 }
 0x103   :  { %v2782_v48 = vpop.f32.mrf.mxu0 }
 0x104   :  { %v2804_v49 = vpop.f32.mrf.mxu1 }
 0x105   :  { %v2783_v50 = vpop.f32.mrf.mxu0  ;;  %2853 = vmatpush3.bf16.msra.mxu1 %v3694_v23 }
 0x106   :  { %v2784_v52 = vadd.f32 %v2783_v50, %v2782_v48  ;;  %2854 = vmatprep.subr.bf16.mxu1 %v3706_v25  ;;  %v2805_v53 = vpop.f32.mrf.mxu1 }
 0x107   :  { %v2785_v54 = vpop.f32.mrf.mxu0  ;;  %v2806_v56 = vadd.f32 %v2805_v53, %v2804_v49 }
 0x108   :  { %v483_v55 = vadd.f32 %v2784_v52, %v3837_v62  ;;  %v2807_v58 = vpop.f32.mrf.mxu1 }
 0x109   :  { %v2786_v60 = vpop.f32.mrf.mxu0  ;;  %2855 = vmatpush3.bf16.msra.mxu1 %v3718_v27 }
 0x10a   :  { %v523_v61 = vadd.f32 %v2806_v56, %v483_v55  ;;  %2856 = vmatprep.subr.bf16.mxu1 %v3730_v30  ;;  %v2808_v63 = vpop.f32.mrf.mxu1 }
 0x10c   :  { %v528_v28 = vmax.f32 %v523_v61, 0.0 }
 0x10d   :  { %2857 = vmatpush3.bf16.msra.mxu1 %v3742_v32 }
 0x10e   :  { %v529_v35 = vpack.c.bf16 %v528_v28, %v528_v28  ;;  %2869 = vmatprep.subr.bf16.mxu1 %v3557_v0  ;;  %v3360_v0 = vld [vmem:[%s4579_s3 + $0x58] sm:$0xff]  }
 0x110   :  { %3216 = vmatmul.mubr.msk.bf16.vlgmr.msra.gmra.mxu0 %vm562_vm1, %v529_v35  ;;  %777 = vmatmul.mubr.bf16.vlgmr.msra.gmra.mxu1 %v698_v34  ;;  %v888_v35 = vcombine.high %v886_v39, %v886_v39 }
 0x111   :  { %2821 = vmatpush3.bf16.msra.mxu0 %v3568_v2  ;;  %736 = vmatprep.mubr.bf16.mxu0 %v697_v42 }
 0x112   :  { %2822 = vmatprep.subr.bf16.mxu0 %v3580_v4  ;;  %2870 = vmatpush3.bf16.msra.mxu1 %v3568_v2  ;;  %v3361_v2 = vld [vmem:[%s4579_s3 + $0x50] sm:$0xff]  }
 0x113   :  { %2871 = vmatprep.subr.bf16.mxu1 %v3580_v4  ;;  %925 = vmatprep.mubr.bf16.mxu1 %v886_v39 }
 0x115   :  { %2823 = vmatpush3.bf16.msra.mxu0 %v3592_v6 }
 0x116   :  { %2824 = vmatprep.subr.bf16.mxu0 %v3604_v8  ;;  %2872 = vmatpush3.bf16.msra.mxu1 %v3592_v6 }
 0x117   :  { %2873 = vmatprep.subr.bf16.mxu1 %v3604_v8 }
 0x119   :  { %2825 = vmatpush3.bf16.msra.mxu0 %v3616_v10 }
 0x11a   :  { %2826 = vmatprep.subr.bf16.mxu0 %v3628_v12  ;;  %2874 = vmatpush3.bf16.msra.mxu1 %v3616_v10 }
 0x11b   :  { %2875 = vmatprep.subr.bf16.mxu1 %v3628_v12 }
 0x11d   :  { %2827 = vmatpush3.bf16.msra.mxu0 %v3640_v14 }
 0x11e   :  { %2828 = vmatprep.subr.bf16.mxu0 %v3652_v16  ;;  %2876 = vmatpush3.bf16.msra.mxu1 %v3640_v14 }
 0x11f   :  { %2877 = vmatprep.subr.bf16.mxu1 %v3652_v16 }
 0x121   :  { %2829 = vmatpush3.bf16.msra.mxu0 %v3664_v18 }
 0x122   :  { %2830 = vmatprep.subr.bf16.mxu0 %v3676_v20  ;;  %2878 = vmatpush3.bf16.msra.mxu1 %v3664_v18 }
 0x123   :  { %2879 = vmatprep.subr.bf16.mxu1 %v3676_v20 }
 0x125   :  { %2831 = vmatpush3.bf16.msra.mxu0 %v3688_v22 }
 0x126   :  { %2832 = vmatprep.subr.bf16.mxu0 %v3700_v24  ;;  %2880 = vmatpush3.bf16.msra.mxu1 %v3688_v22 }
 0x127   :  { %2881 = vmatprep.subr.bf16.mxu1 %v3700_v24 }
 0x129   :  { %2833 = vmatpush3.bf16.msra.mxu0 %v3712_v26 }
 0x12a   :  { %2834 = vmatprep.subr.bf16.mxu0 %v3724_v29  ;;  %2882 = vmatpush3.bf16.msra.mxu1 %v3712_v26 }
 0x12b   :  { %2883 = vmatprep.subr.bf16.mxu1 %v3724_v29 }
 0x12d   :  { %2835 = vmatpush3.bf16.msra.mxu0 %v3736_v31 }
 0x12e   :  { %3231 = vmatprep.subr.bf16.mxu0 %v3500_v51  ;;  %2884 = vmatpush3.bf16.msra.mxu1 %v3736_v31 }
 0x12f   :  { %3243 = vmatprep.subr.bf16.mxu1 %v3500_v51 }
 0x130   :  { %737 = vmatmul.mubr.bf16.vlgmr.msra.gmra.mxu0 %v690_v57 }
 0x131   :  { %3239 = vmatprep.mubr.msk.bf16.mxu0 %vm3501_vm0, %v3500_v51  ;;  %3232 = vmatpush3.bf16.msra.mxu0 %v3360_v0 }
 0x132   :  { %3233 = vmatprep.subr.bf16.mxu0 %v3500_v51  ;;  %926 = vmatmul.mubr.bf16.vlgmr.msra.gmra.mxu1 %v879_v40 }
 0x133   :  { %3251 = vmatprep.mubr.msk.bf16.mxu1 %vm3501_vm0, %v3500_v51 }
 0x135   :  { %3234 = vmatpush3.bf16.msra.mxu0 %v3361_v2 }
 0x136   :  { %3235 = vmatprep.subr.bf16.mxu0 %v3500_v51 }
 0x139   :  { %3236 = vmatpush3.bf16.msra.mxu0 %v3362_v59 }
 0x13a   :  { %3237 = vmatprep.subr.bf16.mxu0 %v3500_v51 }
 0x13d   :  { %3238 = vmatpush3.bf16.msra.mxu0 %v3363_v36 }
 0x13e   :  { %2891 = vmatprep.subr.bf16.mxu0 %v3562_v1 }
 0x1b0   :  { %v667_v42 = vpop.f32.mrf.mxu1 }
 0x1b2   :  { %v3229_v43 = vpop.f32.mrf.mxu1 }
 0x1b4   :  { %v670_v44 = vpop.f32.mrf.mxu1 }
 0x1b6   :  { %v3230_v45 = vpop.f32.mrf.mxu1 }
 0x1d0   :  { %v600_v46 = vpop.f32.mrf.mxu0  ;;  %v2858_v1 = vpop.f32.mrf.mxu1 }
 0x1d1   :  { %v3918_v47 = vadd.f32 %v667_v42, %v600_v46 }
 0x1d2   :  { %v3217_v48 = vpop.f32.mrf.mxu0  ;;  %v2859_v49 = vpop.f32.mrf.mxu1 }
 0x1d3   :  { %v2860_v60 = vadd.f32 %v2859_v49, %v2858_v1  ;;  %v4006_v48 = vld [vmem:[%s4577_s1 + $0xf0] sm:$0xff]  }
 0x1d4   :  { %v603_v50 = vpop.f32.mrf.mxu0  ;;  %v2861_v52 = vpop.f32.mrf.mxu1  ;;  %v4012_v49 = vld [vmem:[%s4577_s1 + $0xb0] sm:$0xff]  }
 0x1d5   :  { %v4018_v50 = vld [vmem:[%s4577_s1 + $0xe8] sm:$0xff]  }
 0x1d6   :  { %v3218_v53 = vpop.f32.mrf.mxu0  ;;  %v2862_v54 = vpop.f32.mrf.mxu1  ;;  %v4024_v52 = vld [vmem:[%s4577_s1 + $0xa8] sm:$0xff]  }
 0x1d7   :  { %v4030_v53 = vld [vmem:[%s4577_s1 + $0xe0] sm:$0xff]  }
 0x1d8   :  { %v4036_v54 = vld [vmem:[%s4577_s1 + $0xa0] sm:$0xff]  }
 0x1f0   :  { %v2836_v55 = vpop.f32.mrf.mxu0 }
 0x1f2   :  { %v2837_v56 = vpop.f32.mrf.mxu0 }
 0x1f3   :  { %v2838_v57 = vadd.f32 %v2837_v56, %v2836_v55  ;;  %v4042_v55 = vld [vmem:[%s4577_s1 + $0xd8] sm:$0xff]  }
 0x1f4   :  { %v2839_v58 = vpop.f32.mrf.mxu0 }
 0x1f5   :  { %v739_v61 = vadd.f32 %v2838_v57, %v3837_v62  ;;  %v4099_v57 = vld [vmem:[%s4577_s1 + $0x18] sm:$0xff]   ;;  %v4105_v58 = vld [vmem:[%s4577_s1 + $0x50] sm:$0xff]  }
 0x1f6   :  { %v2840_v63 = vpop.f32.mrf.mxu0 }
 0x1f7   :  { %v779_v28 = vadd.f32 %v2860_v60, %v739_v61  ;;  %v4111_v60 = vld [vmem:[%s4577_s1 + $0x10] sm:$0xff]   ;;  %v4117_v61 = vld [vmem:[%s4577_s1 + $0x48] sm:$0xff]   ;;  %v3368_v63 = vld [vmem:[%s4579_s3 + $0x98] sm:$0xff]  }
 0x1f9   :  { %v784_v34 = vmax.f32 %v779_v28, 0.0  ;;  %v3369_v28 = vld [vmem:[%s4579_s3 + $0x90] sm:$0xff]  }
 0x1fb   :  { %v785_v0 = vpack.c.bf16 %v784_v34, %v784_v34 }
 0x1fd   :  { %3240 = vmatmul.mubr.msk.bf16.vlgmr.msra.gmra.mxu0 %vm562_vm1, %v785_v0  ;;  %v3370_v0 = vld [vmem:[%s4579_s3 + $0x88] sm:$0xff]  }
 0x1fe   :  { %2892 = vmatpush3.bf16.msra.mxu0 %v3574_v3  ;;  %965 = vmatprep.mubr.bf16.mxu0 %v888_v35  ;;  %v887_v3 = vcombine.high %v879_v40, %v879_v40 }
 0x1ff   :  { %2893 = vmatprep.subr.bf16.mxu0 %v3586_v5  ;;  %v3940_v5 = vld [vmem:[%s4577_s1 + $0x78] sm:$0xff]  }
 0x202   :  { %2894 = vmatpush3.bf16.msra.mxu0 %v3598_v7  ;;  %v3946_v7 = vld [vmem:[%s4577_s1 + $0x38] sm:$0xff]  }
 0x203   :  { %2895 = vmatprep.subr.bf16.mxu0 %v3610_v9 }
 0x206   :  { %2896 = vmatpush3.bf16.msra.mxu0 %v3622_v11 }
 0x207   :  { %2897 = vmatprep.subr.bf16.mxu0 %v3634_v13  ;;  %v3366_v13 = vld [vmem:[%s4579_s3 + $0x68] sm:$0xff]  }
 0x20a   :  { %2898 = vmatpush3.bf16.msra.mxu0 %v3646_v15  ;;  %v3982_v15 = vld [vmem:[%s4577_s1 + $0xf8] sm:$0xff]  }
 0x20b   :  { %2899 = vmatprep.subr.bf16.mxu0 %v3658_v17 }
 0x20e   :  { %2900 = vmatpush3.bf16.msra.mxu0 %v3670_v19 }
 0x20f   :  { %2901 = vmatprep.subr.bf16.mxu0 %v3682_v21 }
 0x212   :  { %2902 = vmatpush3.bf16.msra.mxu0 %v3694_v23 }
 0x213   :  { %2903 = vmatprep.subr.bf16.mxu0 %v3706_v25 }
 0x216   :  { %2904 = vmatpush3.bf16.msra.mxu0 %v3718_v27 }
 0x217   :  { %2905 = vmatprep.subr.bf16.mxu0 %v3730_v30 }
 0x21a   :  { %2906 = vmatpush3.bf16.msra.mxu0 %v3742_v32 }
 0x21b   :  { %2918 = vmatprep.subr.bf16.mxu0 %v3940_v5 }
 0x21d   :  { %966 = vmatmul.mubr.bf16.vlgmr.msra.gmra.mxu0 %v887_v3  ;;  %v3371_v3 = vld [vmem:[%s4579_s3 + $0x80] sm:$0xff]  }
 0x21e   :  { %2919 = vmatpush3.bf16.msra.mxu0 %v3946_v7 }
 0x21f   :  { %2920 = vmatprep.subr.bf16.mxu0 %v3580_v4  ;;  %v3364_v4 = vld [vmem:[%s4579_s3 + $0x78] sm:$0xff]  }
 0x220   :  { %3244 = vmatpush3.bf16.msra.mxu1 %v3364_v4  ;;  %v2643_v4 = vld.sshfl [vmem:[%s4576_s0 + $0x14] sm:$0x33 pattern:$0x75316420] }
 0x221   :  { %3245 = vmatprep.subr.bf16.mxu1 %v3500_v51 }
 0x222   :  { %2921 = vmatpush3.bf16.msra.mxu0 %v3592_v6  ;;  %v3365_v6 = vld [vmem:[%s4579_s3 + $0x70] sm:$0xff]  }
 0x223   :  { %2922 = vmatprep.subr.bf16.mxu0 %v3604_v8  ;;  %v2885_v8 = vpop.f32.mrf.mxu1 }
 0x224   :  { %3246 = vmatpush3.bf16.msra.mxu1 %v3365_v6  ;;  %v1250_v6 = vcombine.high %v2643_v4, %v2643_v4 }
 0x225   :  { %3247 = vmatprep.subr.bf16.mxu1 %v3500_v51  ;;  %v2886_v9 = vpop.f32.mrf.mxu1 }
 0x226   :  { %2923 = vmatpush3.bf16.msra.mxu0 %v3616_v10  ;;  %v2887_v10 = vadd.f32 %v2886_v9, %v2885_v8  ;;  %v1264_v8 = vrot.slane %v1250_v6, %v3757_v41  ;;  %v1257_v9 = vrot.slane %v2643_v4, %v3757_v41  ;;  %v3375_v4 = vld [vmem:[%s4579_s3 + $0xa0] sm:$0xff]   ;;  %v2650_v6 = vld.sshfl [vmem:[%s4576_s0 + $0x18] sm:$0x33 pattern:$0x75316420] }
 0x227   :  { %2924 = vmatprep.subr.bf16.mxu0 %v3628_v12  ;;  %v2888_v11 = vpop.f32.mrf.mxu1 }
 0x228   :  { %3248 = vmatpush3.bf16.msra.mxu1 %v3366_v13  ;;  %v928_v39 = vadd.f32 %v2887_v10, %v3837_v62 }
 0x229   :  { %v2889_v12 = vpop.f32.mrf.mxu1  ;;  %3249 = vmatprep.subr.bf16.mxu1 %v3500_v51 }
 0x22a   :  { %2925 = vmatpush3.bf16.msra.mxu0 %v3640_v14  ;;  %v3367_v14 = vld [vmem:[%s4579_s3 + $0x60] sm:$0xff]  }
 0x22b   :  { %2926 = vmatprep.subr.bf16.mxu0 %v3652_v16  ;;  %v2636_v16 = vld.sshfl [vmem:[%s4576_s0 + $0x10] sm:$0x33 pattern:$0x75316420] }
 0x22c   :  { %3250 = vmatpush3.bf16.msra.mxu1 %v3367_v14  ;;  %v1061_v17 = vcombine.high %v2636_v16, %v2636_v16 }
 0x22d   :  { %2940 = vmatprep.subr.bf16.mxu1 %v3982_v15 }
 0x22e   :  { %2927 = vmatpush3.bf16.msra.mxu0 %v3664_v18  ;;  %v1075_v18 = vrot.slane %v1061_v17, %v3757_v41 }
 0x22f   :  { %2928 = vmatprep.subr.bf16.mxu0 %v3676_v20  ;;  %v1068_v20 = vrot.slane %v2636_v16, %v3757_v41 }
 0x230   :  { %1114 = vmatprep.mubr.bf16.mxu0 %v1075_v18  ;;  %v1077_v46 = vcombine.high %v1075_v18, %v1075_v18 }
 0x231   :  { %v1076_v56 = vcombine.high %v1068_v20, %v1068_v20 }
 0x232   :  { %2929 = vmatpush3.bf16.msra.mxu0 %v3688_v22 }
 0x233   :  { %2930 = vmatprep.subr.bf16.mxu0 %v3700_v24 }
 0x236   :  { %2931 = vmatpush3.bf16.msra.mxu0 %v3712_v26 }
 0x237   :  { %2932 = vmatprep.subr.bf16.mxu0 %v3724_v29 }
 0x23a   :  { %2933 = vmatpush3.bf16.msra.mxu0 %v3736_v31 }
 0x23b   :  { %3255 = vmatprep.subr.bf16.mxu0 %v3500_v51 }
 0x23d   :  { %1115 = vmatmul.mubr.bf16.vlgmr.msra.gmra.mxu0 %v1068_v20 }
 0x23e   :  { %3263 = vmatprep.mubr.msk.bf16.mxu0 %vm3501_vm0, %v3500_v51  ;;  %3256 = vmatpush3.bf16.msra.mxu0 %v3368_v63  ;;  %v4230_v63 = vld [vmem:[%s4577_s1] sm:$0xff]  }
 0x23f   :  { %3257 = vmatprep.subr.bf16.mxu0 %v3500_v51 }
 0x242   :  { %3258 = vmatpush3.bf16.msra.mxu0 %v3369_v28  ;;  %v3372_v28 = vld [vmem:[%s4579_s3 + $0xb8] sm:$0xff]  }
 0x243   :  { %3259 = vmatprep.subr.bf16.mxu0 %v3500_v51 }
 0x246   :  { %3260 = vmatpush3.bf16.msra.mxu0 %v3370_v0 }
 0x247   :  { %3261 = vmatprep.subr.bf16.mxu0 %v3500_v51 }
 0x24a   :  { %3262 = vmatpush3.bf16.msra.mxu0 %v3371_v3  ;;  %v3374_v3 = vld [vmem:[%s4579_s3 + $0xa8] sm:$0xff]  }
 0x24b   :  { %2989 = vmatprep.subr.bf16.mxu0 %v3982_v15 }
 0x2bd   :  { %v855_v22 = vpop.f32.mrf.mxu0 }
 0x2be   :  { %v3993_v24 = vadd.f32 %v855_v22, %v3918_v47  ;;  %v4000_v47 = vld [vmem:[%s4577_s1 + $0xb8] sm:$0xff]  }
 0x2bf   :  { %v3241_v2 = vpop.f32.mrf.mxu0 }
 0x2c1   :  { %v858_v59 = vpop.f32.mrf.mxu0 }
 0x2c3   :  { %v3242_v36 = vpop.f32.mrf.mxu0 }
 0x2dd   :  { %v2907_v37 = vpop.f32.mrf.mxu0 }
 0x2df   :  { %v2908_v38 = vpop.f32.mrf.mxu0 }
 0x2e0   :  { %v2909_v40 = vadd.f32 %v2908_v38, %v2907_v37  ;;  %v1266_v37 = vcombine.high %v1264_v8, %v1264_v8 }
 0x2e1   :  { %v2910_v42 = vpop.f32.mrf.mxu0 }
 0x2e2   :  { %v968_v43 = vadd.f32 %v2909_v40, %v928_v39  ;;  %v4169_v39 = vld [vmem:[%s4577_s1 + $0xd0] sm:$0xff]   ;;  %v4181_v42 = vld [vmem:[%s4577_s1 + $0xc8] sm:$0xff]  }
 0x2e3   :  { %v2911_v44 = vpop.f32.mrf.mxu0  ;;  %v4175_v40 = vld [vmem:[%s4577_s1 + $0x90] sm:$0xff]  }
 0x2e4   :  { %v973_v45 = vmax.f32 %v968_v43, 0.0  ;;  %v4187_v43 = vld [vmem:[%s4577_s1 + $0x88] sm:$0xff]   ;;  %v4193_v44 = vld [vmem:[%s4577_s1 + $0xc0] sm:$0xff]  }
 0x2e6   :  { %v974_v1 = vpack.c.bf16 %v973_v45, %v973_v45  ;;  %v1265_v45 = vcombine.high %v1257_v9, %v1257_v9 }
 0x2e8   :  { %3252 = vmatmul.mubr.msk.bf16.vlgmr.msra.gmra.mxu1 %vm562_vm1, %v974_v1  ;;  %v4218_v1 = vld [vmem:[%s4577_s1 + $0x8] sm:$0xff]  }
 0x2e9   :  { %2941 = vmatpush3.bf16.msra.mxu1 %v4000_v47  ;;  %1154 = vmatprep.mubr.bf16.mxu1 %v1077_v46  ;;  %v4199_v46 = vld [vmem:[%s4577_s1 + $0x80] sm:$0xff]  }
 0x2ea   :  { %2942 = vmatprep.subr.bf16.mxu1 %v4006_v48 }
 0x2ed   :  { %2943 = vmatpush3.bf16.msra.mxu1 %v4012_v49 }
 0x2ee   :  { %2944 = vmatprep.subr.bf16.mxu1 %v4018_v50 }
 0x2f1   :  { %2945 = vmatpush3.bf16.msra.mxu1 %v4024_v52 }
 0x2f2   :  { %2946 = vmatprep.subr.bf16.mxu1 %v4030_v53 }
 0x2f5   :  { %2947 = vmatpush3.bf16.msra.mxu1 %v4036_v54 }
 0x2f6   :  { %2948 = vmatprep.subr.bf16.mxu1 %v4042_v55 }
 0x2f9   :  { %2949 = vmatpush3.bf16.msra.mxu1 %v3670_v19  ;;  %v4057_v19 = vld [vmem:[%s4577_s1 + $0x70] sm:$0xff]  }
 0x2fa   :  { %2950 = vmatprep.subr.bf16.mxu1 %v3682_v21  ;;  %v4063_v21 = vld [vmem:[%s4577_s1 + $0x30] sm:$0xff]  }
 0x2fd   :  { %2951 = vmatpush3.bf16.msra.mxu1 %v3694_v23  ;;  %v4069_v23 = vld [vmem:[%s4577_s1 + $0x68] sm:$0xff]  }
 0x2fe   :  { %2952 = vmatprep.subr.bf16.mxu1 %v3706_v25  ;;  %v4075_v25 = vld [vmem:[%s4577_s1 + $0x28] sm:$0xff]  }
 0x301   :  { %2953 = vmatpush3.bf16.msra.mxu1 %v3718_v27  ;;  %v4081_v27 = vld [vmem:[%s4577_s1 + $0x60] sm:$0xff]  }
 0x302   :  { %2954 = vmatprep.subr.bf16.mxu1 %v3730_v30  ;;  %v4087_v30 = vld [vmem:[%s4577_s1 + $0x20] sm:$0xff]  }
 0x305   :  { %2955 = vmatpush3.bf16.msra.mxu1 %v3742_v32  ;;  %v4093_v32 = vld [vmem:[%s4577_s1 + $0x58] sm:$0xff]  }
 0x306   :  { %2967 = vmatprep.subr.bf16.mxu1 %v3940_v5 }
 0x308   :  { %1155 = vmatmul.mubr.bf16.vlgmr.msra.gmra.mxu1 %v1076_v56  ;;  %v4224_v56 = vld [vmem:[%s4577_s1 + $0x40] sm:$0xff]  }
 0x309   :  { %2968 = vmatpush3.bf16.msra.mxu1 %v3946_v7  ;;  %1303 = vmatprep.mubr.bf16.mxu1 %v1264_v8  ;;  %v1439_v8 = vcombine.high %v2650_v6, %v2650_v6 }
 0x30a   :  { %2969 = vmatprep.subr.bf16.mxu1 %v4057_v19 }
 0x30d   :  { %2970 = vmatpush3.bf16.msra.mxu1 %v4063_v21 }
 0x30e   :  { %2971 = vmatprep.subr.bf16.mxu1 %v4069_v23 }
 0x311   :  { %2972 = vmatpush3.bf16.msra.mxu1 %v4075_v25 }
 0x312   :  { %2973 = vmatprep.subr.bf16.mxu1 %v4081_v27 }
 0x315   :  { %2974 = vmatpush3.bf16.msra.mxu1 %v4087_v30 }
 0x316   :  { %2975 = vmatprep.subr.bf16.mxu1 %v4093_v32 }
 0x319   :  { %2976 = vmatpush3.bf16.msra.mxu1 %v4099_v57 }
 0x31a   :  { %2977 = vmatprep.subr.bf16.mxu1 %v4105_v58 }
 0x31d   :  { %2978 = vmatpush3.bf16.msra.mxu1 %v4111_v60 }
 0x31e   :  { %2979 = vmatprep.subr.bf16.mxu1 %v4117_v61 }
 0x321   :  { %2980 = vmatpush3.bf16.msra.mxu1 %v3712_v26  ;;  %v2934_v26 = vpop.f32.mrf.mxu0 }
 0x322   :  { %2981 = vmatprep.subr.bf16.mxu1 %v3724_v29 }
 0x323   :  { %v2935_v29 = vpop.f32.mrf.mxu0 }
 0x324   :  { %v2936_v34 = vadd.f32 %v2935_v29, %v2934_v26  ;;  %v3373_v26 = vld [vmem:[%s4579_s3 + $0xb0] sm:$0xff]  }
 0x325   :  { %2982 = vmatpush3.bf16.msra.mxu1 %v3736_v31  ;;  %v2937_v31 = vpop.f32.mrf.mxu0 }
 0x326   :  { %3267 = vmatprep.subr.bf16.mxu1 %v3500_v51  ;;  %v1117_v18 = vadd.f32 %v2936_v34, %v3837_v62 }
 0x327   :  { %v2938_v35 = vpop.f32.mrf.mxu0 }
 0x328   :  { %1304 = vmatmul.mubr.bf16.vlgmr.msra.gmra.mxu1 %v1257_v9  ;;  %v1453_v9 = vrot.slane %v1439_v8, %v3757_v41  ;;  %v2657_v8 = vld.sshfl [vmem:[%s4576_s0 + $0x1c] sm:$0x33 pattern:$0x75316420] }
 0x329   :  { %3275 = vmatprep.mubr.msk.bf16.mxu1 %vm3501_vm0, %v3500_v51  ;;  %3268 = vmatpush3.bf16.msra.mxu1 %v3372_v28 }
 0x32a   :  { %3269 = vmatprep.subr.bf16.mxu1 %v3500_v51 }
 0x32d   :  { %3270 = vmatpush3.bf16.msra.mxu1 %v3373_v26  ;;  %v3376_v26 = vld [vmem:[%s4579_s3 + $0xd8] sm:$0xff]  }
 0x32e   :  { %3271 = vmatprep.subr.bf16.mxu1 %v3500_v51 }
 0x331   :  { %3272 = vmatpush3.bf16.msra.mxu1 %v3374_v3 }
 0x332   :  { %3273 = vmatprep.subr.bf16.mxu1 %v3500_v51 }
 0x335   :  { %3274 = vmatpush3.bf16.msra.mxu1 %v3375_v4  ;;  %v3378_v4 = vld [vmem:[%s4579_s3 + $0xc8] sm:$0xff]  }
 0x336   :  { %3038 = vmatprep.subr.bf16.mxu1 %v3982_v15 }
 0x3a8   :  { %v1044_v10 = vpop.f32.mrf.mxu1 }
 0x3a9   :  { %v4148_v11 = vadd.f32 %v1044_v10, %v3993_v24  ;;  %v4163_v24 = vld [vmem:[%s4577_s1 + $0x98] sm:$0xff]   ;;  %v1446_v10 = vrot.slane %v2650_v6, %v3757_v41  ;;  %v3379_v6 = vld [vmem:[%s4579_s3 + $0xc0] sm:$0xff]  }
 0x3aa   :  { %v3253_v12 = vpop.f32.mrf.mxu1 }
 0x3ac   :  { %v1047_v13 = vpop.f32.mrf.mxu1 }
 0x3ae   :  { %v3254_v14 = vpop.f32.mrf.mxu1 }
 0x3c8   :  { %v2956_v16 = vpop.f32.mrf.mxu1 }
 0x3ca   :  { %v2957_v17 = vpop.f32.mrf.mxu1 }
 0x3cb   :  { %v2958_v20 = vadd.f32 %v2957_v17, %v2956_v16 }
 0x3cc   :  { %v2959_v22 = vpop.f32.mrf.mxu1 }
 0x3cd   :  { %v1157_v2 = vadd.f32 %v2958_v20, %v1117_v18 }
 0x3ce   :  { %v2960_v59 = vpop.f32.mrf.mxu1 }
 0x3cf   :  { %v1162_v36 = vmax.f32 %v1157_v2, 0.0 }
 0x3d1   :  { %v1163_v38 = vpack.c.bf16 %v1162_v36, %v1162_v36 }
 0x3d3   :  { %3264 = vmatmul.mubr.msk.bf16.vlgmr.msra.gmra.mxu0 %vm562_vm1, %v1163_v38 }
 0x3d4   :  { %2990 = vmatpush3.bf16.msra.mxu0 %v4000_v47  ;;  %1343 = vmatprep.mubr.bf16.mxu0 %v1266_v37 }
 0x3d5   :  { %2991 = vmatprep.subr.bf16.mxu0 %v4006_v48 }
 0x3d8   :  { %2992 = vmatpush3.bf16.msra.mxu0 %v4012_v49 }
 0x3d9   :  { %2993 = vmatprep.subr.bf16.mxu0 %v4018_v50 }
 0x3dc   :  { %2994 = vmatpush3.bf16.msra.mxu0 %v4024_v52 }
 0x3dd   :  { %2995 = vmatprep.subr.bf16.mxu0 %v4030_v53 }
 0x3e0   :  { %2996 = vmatpush3.bf16.msra.mxu0 %v4036_v54 }
 0x3e1   :  { %2997 = vmatprep.subr.bf16.mxu0 %v4042_v55 }
 0x3e4   :  { %2998 = vmatpush3.bf16.msra.mxu0 %v4163_v24 }
 0x3e5   :  { %2999 = vmatprep.subr.bf16.mxu0 %v4169_v39 }
 0x3e8   :  { %3000 = vmatpush3.bf16.msra.mxu0 %v4175_v40  ;;  %v2983_v29 = vpop.f32.mrf.mxu1 }
 0x3e9   :  { %3001 = vmatprep.subr.bf16.mxu0 %v4181_v42 }
 0x3ea   :  { %v2984_v34 = vpop.f32.mrf.mxu1 }
 0x3eb   :  { %v2985_v31 = vadd.f32 %v2984_v34, %v2983_v29  ;;  %v3377_v29 = vld [vmem:[%s4579_s3 + $0xd0] sm:$0xff]  }
 0x3ec   :  { %3002 = vmatpush3.bf16.msra.mxu0 %v4187_v43  ;;  %v2986_v35 = vpop.f32.mrf.mxu1 }
 0x3ed   :  { %3003 = vmatprep.subr.bf16.mxu0 %v4193_v44  ;;  %v1306_v22 = vadd.f32 %v2985_v31, %v3837_v62 }
 0x3ee   :  { %v2987_v0 = vpop.f32.mrf.mxu1 }
 0x3f0   :  { %3004 = vmatpush3.bf16.msra.mxu0 %v4199_v46 }
 0x3f1   :  { %3016 = vmatprep.subr.bf16.mxu0 %v3940_v5 }
 0x3f3   :  { %1344 = vmatmul.mubr.bf16.vlgmr.msra.gmra.mxu0 %v1265_v45  ;;  %v1455_v45 = vcombine.high %v1453_v9, %v1453_v9 }
 0x3f4   :  { %3017 = vmatpush3.bf16.msra.mxu0 %v3946_v7  ;;  %1492 = vmatprep.mubr.bf16.mxu0 %v1453_v9  ;;  %v1628_v9 = vcombine.high %v2657_v8, %v2657_v8 }
 0x3f5   :  { %3018 = vmatprep.subr.bf16.mxu0 %v4057_v19 }
 0x3f8   :  { %3019 = vmatpush3.bf16.msra.mxu0 %v4063_v21 }
 0x3f9   :  { %3020 = vmatprep.subr.bf16.mxu0 %v4069_v23 }
 0x3fc   :  { %3021 = vmatpush3.bf16.msra.mxu0 %v4075_v25 }
 0x3fd   :  { %3022 = vmatprep.subr.bf16.mxu0 %v4081_v27 }
 0x400   :  { %3023 = vmatpush3.bf16.msra.mxu0 %v4087_v30 }
 0x401   :  { %3024 = vmatprep.subr.bf16.mxu0 %v4093_v32 }
 0x404   :  { %3025 = vmatpush3.bf16.msra.mxu0 %v4099_v57 }
 0x405   :  { %3026 = vmatprep.subr.bf16.mxu0 %v4105_v58 }
 0x408   :  { %3027 = vmatpush3.bf16.msra.mxu0 %v4111_v60 }
 0x409   :  { %3028 = vmatprep.subr.bf16.mxu0 %v4117_v61 }
 0x40c   :  { %3029 = vmatpush3.bf16.msra.mxu0 %v4218_v1 }
 0x40d   :  { %3030 = vmatprep.subr.bf16.mxu0 %v4224_v56 }
 0x410   :  { %3031 = vmatpush3.bf16.msra.mxu0 %v4230_v63 }
 0x411   :  { %3279 = vmatprep.subr.bf16.mxu0 %v3500_v51 }
 0x413   :  { %1493 = vmatmul.mubr.bf16.vlgmr.msra.gmra.mxu0 %v1446_v10 }
 0x414   :  { %3287 = vmatprep.mubr.msk.bf16.mxu0 %vm3501_vm0, %v3500_v51  ;;  %3280 = vmatpush3.bf16.msra.mxu0 %v3376_v26 }
 0x415   :  { %3281 = vmatprep.subr.bf16.mxu0 %v3500_v51 }
 0x418   :  { %3282 = vmatpush3.bf16.msra.mxu0 %v3377_v29 }
 0x419   :  { %3283 = vmatprep.subr.bf16.mxu0 %v3500_v51 }
 0x41c   :  { %3284 = vmatpush3.bf16.msra.mxu0 %v3378_v4 }
 0x41d   :  { %3285 = vmatprep.subr.bf16.mxu0 %v3500_v51 }
 0x420   :  { %3286 = vmatpush3.bf16.msra.mxu0 %v3379_v6 }
 0x421   :  { %3087 = vmatprep.subr.bf16.mxu0 %v3982_v15 }
 0x493   :  { %v1233_v12 = vpop.f32.mrf.mxu0 }
 0x494   :  { %v4258_v13 = vadd.f32 %v1233_v12, %v4148_v11  ;;  %v1454_v11 = vcombine.high %v1446_v10, %v1446_v10  ;;  %v1642_v10 = vrot.slane %v1628_v9, %v3757_v41  ;;  %v1635_v12 = vrot.slane %v2657_v8, %v3757_v41 }
 0x495   :  { %v3265_v14 = vpop.f32.mrf.mxu0 }
 0x497   :  { %v1236_v16 = vpop.f32.mrf.mxu0 }
 0x499   :  { %v3266_v17 = vpop.f32.mrf.mxu0 }
 0x4b3   :  { %v3005_v18 = vpop.f32.mrf.mxu0 }
 0x4b5   :  { %v3006_v20 = vpop.f32.mrf.mxu0 }
 0x4b6   :  { %v3007_v2 = vadd.f32 %v3006_v20, %v3005_v18 }
 0x4b7   :  { %v3008_v59 = vpop.f32.mrf.mxu0 }
 0x4b8   :  { %v1346_v36 = vadd.f32 %v3007_v2, %v1306_v22 }
 0x4b9   :  { %v3009_v37 = vpop.f32.mrf.mxu0 }
 0x4ba   :  { %v1351_v38 = vmax.f32 %v1346_v36, 0.0 }
 0x4bc   :  { %v1352_v28 = vpack.c.bf16 %v1351_v38, %v1351_v38 }
 0x4be   :  { %3276 = vmatmul.mubr.msk.bf16.vlgmr.msra.gmra.mxu1 %vm562_vm1, %v1352_v28 }
 0x4bf   :  { %3039 = vmatpush3.bf16.msra.mxu1 %v4000_v47  ;;  %1532 = vmatprep.mubr.bf16.mxu1 %v1455_v45 }
 0x4c0   :  { %3040 = vmatprep.subr.bf16.mxu1 %v4006_v48 }
 0x4c3   :  { %3041 = vmatpush3.bf16.msra.mxu1 %v4012_v49 }
 0x4c4   :  { %3042 = vmatprep.subr.bf16.mxu1 %v4018_v50 }
 0x4c7   :  { %3043 = vmatpush3.bf16.msra.mxu1 %v4024_v52 }
 0x4c8   :  { %3044 = vmatprep.subr.bf16.mxu1 %v4030_v53 }
 0x4cb   :  { %3045 = vmatpush3.bf16.msra.mxu1 %v4036_v54 }
 0x4cc   :  { %3046 = vmatprep.subr.bf16.mxu1 %v4042_v55 }
 0x4cf   :  { %3047 = vmatpush3.bf16.msra.mxu1 %v4163_v24 }
 0x4d0   :  { %3048 = vmatprep.subr.bf16.mxu1 %v4169_v39 }
 0x4d3   :  { %3049 = vmatpush3.bf16.msra.mxu1 %v4175_v40  ;;  %v3032_v34 = vpop.f32.mrf.mxu0 }
 0x4d4   :  { %3050 = vmatprep.subr.bf16.mxu1 %v4181_v42 }
 0x4d5   :  { %v3033_v31 = vpop.f32.mrf.mxu0 }
 0x4d6   :  { %v3034_v35 = vadd.f32 %v3033_v31, %v3032_v34 }
 0x4d7   :  { %3051 = vmatpush3.bf16.msra.mxu1 %v4187_v43  ;;  %v3035_v0 = vpop.f32.mrf.mxu0 }
 0x4d8   :  { %3052 = vmatprep.subr.bf16.mxu1 %v4193_v44  ;;  %v1495_v59 = vadd.f32 %v3034_v35, %v3837_v62 }
 0x4d9   :  { %v3036_v3 = vpop.f32.mrf.mxu0 }
 0x4db   :  { %3053 = vmatpush3.bf16.msra.mxu1 %v4199_v46 }
 0x4dc   :  { %3065 = vmatprep.subr.bf16.mxu1 %v3940_v5 }
 0x4de   :  { %1533 = vmatmul.mubr.bf16.vlgmr.msra.gmra.mxu1 %v1454_v11  ;;  %v1644_v11 = vcombine.high %v1642_v10, %v1642_v10 }
 0x4df   :  { %3066 = vmatpush3.bf16.msra.mxu1 %v3946_v7  ;;  %1681 = vmatprep.mubr.bf16.mxu1 %v1642_v10 }
 0x4e0   :  { %3067 = vmatprep.subr.bf16.mxu1 %v4057_v19 }
 0x4e3   :  { %3068 = vmatpush3.bf16.msra.mxu1 %v4063_v21 }
 0x4e4   :  { %3069 = vmatprep.subr.bf16.mxu1 %v4069_v23 }
 0x4e7   :  { %3070 = vmatpush3.bf16.msra.mxu1 %v4075_v25 }
 0x4e8   :  { %3071 = vmatprep.subr.bf16.mxu1 %v4081_v27 }
 0x4eb   :  { %3072 = vmatpush3.bf16.msra.mxu1 %v4087_v30 }
 0x4ec   :  { %3073 = vmatprep.subr.bf16.mxu1 %v4093_v32 }
 0x4ef   :  { %3074 = vmatpush3.bf16.msra.mxu1 %v4099_v57 }
 0x4f0   :  { %3075 = vmatprep.subr.bf16.mxu1 %v4105_v58 }
 0x4f3   :  { %3076 = vmatpush3.bf16.msra.mxu1 %v4111_v60 }
 0x4f4   :  { %3077 = vmatprep.subr.bf16.mxu1 %v4117_v61 }
 0x4f7   :  { %3078 = vmatpush3.bf16.msra.mxu1 %v4218_v1 }
 0x4f8   :  { %3079 = vmatprep.subr.bf16.mxu1 %v4224_v56 }
 0x4fb   :  { %3080 = vmatpush3.bf16.msra.mxu1 %v4230_v63 }
 0x4fc   :  { %3291 = vmatprep.subr.bf16.mxu1 %v3500_v51 }
 0x4fe   :  { %1682 = vmatmul.mubr.bf16.vlgmr.msra.gmra.mxu1 %v1635_v12 }
 0x4ff   :  { %3299 = vmatprep.mubr.msk.bf16.mxu1 %vm3501_vm0, %v3500_v51 }
 0x57e   :  { %v1422_v14 = vpop.f32.mrf.mxu1 }
 0x57f   :  { %v4318_v16 = vadd.f32 %v1422_v14, %v4258_v13  ;;  %v1643_v13 = vcombine.high %v1635_v12, %v1635_v12 }
 0x580   :  { %v3277_v17 = vpop.f32.mrf.mxu1 }
 0x582   :  { %v1425_v18 = vpop.f32.mrf.mxu1 }
 0x583   :  { %v3476_v18 = vld [vmem:[%s4578_s2] ss:$0 sm:$0xff] }
 0x584   :  { %v3278_v20 = vpop.f32.mrf.mxu1 }
 0x59e   :  { %v3054_v22 = vpop.f32.mrf.mxu1 }
 0x5a0   :  { %v3055_v2 = vpop.f32.mrf.mxu1 }
 0x5a1   :  { %v3056_v36 = vadd.f32 %v3055_v2, %v3054_v22 }
 0x5a2   :  { %v3057_v37 = vpop.f32.mrf.mxu1 }
 0x5a3   :  { %v1535_v38 = vadd.f32 %v3056_v36, %v1495_v59 }
 0x5a4   :  { %v3058_v45 = vpop.f32.mrf.mxu1 }
 0x5a5   :  { %v1540_v28 = vmax.f32 %v1535_v38, 0.0  ;;  %v3391_v38 = vld [vmem:[%s4581_s5 + $0x68] ss:$16 sps:$4 sm:$0xff]  }
 0x5a7   :  { %v1541_v26 = vpack.c.bf16 %v1540_v28, %v1540_v28  ;;  %v3399_v28 = vld [vmem:[%s4581_s5 + $0x4c] ss:$16 sps:$4 sm:$0xff]  }
 0x5a9   :  { %3288 = vmatmul.mubr.msk.bf16.vlgmr.msra.gmra.mxu0 %vm562_vm1, %v1541_v26  ;;  %v3402_v26 = vld [vmem:[%s4581_s5 + $0x24] ss:$16 sps:$4 sm:$0xff]  }
 0x5aa   :  { %3088 = vmatpush3.bf16.msra.mxu0 %v4000_v47  ;;  %1721 = vmatprep.mubr.bf16.mxu0 %v1644_v11  ;;  %v3397_v11 = vld [vmem:[%s4581_s5 + $0x48] ss:$16 sps:$4 sm:$0xff]  }
 0x5ab   :  { %3089 = vmatprep.subr.bf16.mxu0 %v4006_v48 }
 0x5ae   :  { %3090 = vmatpush3.bf16.msra.mxu0 %v4012_v49 }
 0x5af   :  { %3091 = vmatprep.subr.bf16.mxu0 %v4018_v50 }
 0x5b2   :  { %3092 = vmatpush3.bf16.msra.mxu0 %v4024_v52 }
 0x5b3   :  { %3093 = vmatprep.subr.bf16.mxu0 %v4030_v53 }
 0x5b6   :  { %3094 = vmatpush3.bf16.msra.mxu0 %v4036_v54 }
 0x5b7   :  { %3095 = vmatprep.subr.bf16.mxu0 %v4042_v55 }
 0x5ba   :  { %3096 = vmatpush3.bf16.msra.mxu0 %v4163_v24 }
 0x5bb   :  { %3097 = vmatprep.subr.bf16.mxu0 %v4169_v39 }
 0x5be   :  { %3098 = vmatpush3.bf16.msra.mxu0 %v4175_v40 }
 0x5bf   :  { %3099 = vmatprep.subr.bf16.mxu0 %v4181_v42 }
 0x5c2   :  { %3100 = vmatpush3.bf16.msra.mxu0 %v4187_v43 }
 0x5c3   :  { %3101 = vmatprep.subr.bf16.mxu0 %v4193_v44 }
 0x5c6   :  { %3102 = vmatpush3.bf16.msra.mxu0 %v4199_v46 }
 0x5c7   :  { %3114 = vmatprep.subr.bf16.mxu0 %v3940_v5  ;;  %v3380_v5 = vld [vmem:[%s4579_s3 + $0xf8] sm:$0xff]  }
 0x5c8   :  { %3292 = vmatpush3.bf16.msra.mxu1 %v3380_v5  ;;  %v3400_v5 = vld [vmem:[%s4581_s5 + $0x20] ss:$16 sps:$4 sm:$0xff]  }
 0x5c9   :  { %1722 = vmatmul.mubr.bf16.vlgmr.msra.gmra.mxu0 %v1643_v13  ;;  %3293 = vmatprep.subr.bf16.mxu1 %v3500_v51  ;;  %v3405_v13 = vld [vmem:[%s4581_s5 + $0x2c] ss:$16 sps:$4 sm:$0xff]  }
 0x5ca   :  { %3115 = vmatpush3.bf16.msra.mxu0 %v3946_v7  ;;  %v3381_v7 = vld [vmem:[%s4579_s3 + $0xf0] sm:$0xff]  }
 0x5cb   :  { %3116 = vmatprep.subr.bf16.mxu0 %v4057_v19  ;;  %v3081_v19 = vpop.f32.mrf.mxu1 }
 0x5cc   :  { %3294 = vmatpush3.bf16.msra.mxu1 %v3381_v7  ;;  %v3403_v7 = vld [vmem:[%s4581_s5 + $0x28] ss:$16 sps:$4 sm:$0xff]  }
 0x5cd   :  { %3295 = vmatprep.subr.bf16.mxu1 %v3500_v51 }
 0x5ce   :  { %3117 = vmatpush3.bf16.msra.mxu0 %v4063_v21  ;;  %v3082_v21 = vpop.f32.mrf.mxu1 }
 0x5cf   :  { %3118 = vmatprep.subr.bf16.mxu0 %v4069_v23  ;;  %v3083_v23 = vadd.f32 %v3082_v21, %v3081_v19  ;;  %v3408_v19 = vld [vmem:[%s4581_s5 + $0x4] ss:$16 sps:$4 sm:$0xff]   ;;  %v3411_v21 = vld [vmem:[%s4581_s5 + $0xc] ss:$16 sps:$4 sm:$0xff]  }
 0x5d1   :  { %v1684_v35 = vadd.f32 %v3083_v23, %v3837_v62  ;;  %v3406_v23 = vld [vmem:[%s4581_s5] ss:$16 sps:$4 sm:$0xff]  }
 0x5d2   :  { %3119 = vmatpush3.bf16.msra.mxu0 %v4075_v25  ;;  %v3084_v25 = vpop.f32.mrf.mxu1 }
 0x5d3   :  { %3120 = vmatprep.subr.bf16.mxu0 %v4081_v27  ;;  %v3409_v25 = vld [vmem:[%s4581_s5 + $0x8] ss:$16 sps:$4 sm:$0xff]  }
 0x5d4   :  { %v3085_v27 = vpop.f32.mrf.mxu1 }
 0x5d5   :  { %v3502_v27 = vmov 0  }
 0x5d6   :  { %3121 = vmatpush3.bf16.msra.mxu0 %v4087_v30  ;;  %v3382_v30 = vld [vmem:[%s4579_s3 + $0xe8] sm:$0xff]  }
 0x5d7   :  { %3122 = vmatprep.subr.bf16.mxu0 %v4093_v32  ;;  %3296 = vmatpush3.bf16.msra.mxu1 %v3382_v30  ;;  %v3383_v32 = vld [vmem:[%s4579_s3 + $0xe0] sm:$0xff]   ;;  %v3412_v30 = vld [vmem:[%s4583_s7 + $0x78] sm:$0xff]  }
 0x5d8   :  { %3297 = vmatprep.subr.bf16.mxu1 %v3500_v51 }
 0x5da   :  { %3123 = vmatpush3.bf16.msra.mxu0 %v4099_v57  ;;  %v2664_v57 = vld.sshfl [vmem:[%s4576_s0 + $0x20] sm:$0x33 pattern:$0x75316420] }
 0x5db   :  { %3124 = vmatprep.subr.bf16.mxu0 %v4105_v58  ;;  %3298 = vmatpush3.bf16.msra.mxu1 %v3383_v32  ;;  %v1817_v58 = vcombine.high %v2664_v57, %v2664_v57  ;;  %v3413_v32 = vld [vmem:[%s4583_s7 + $0xf8] sm:$0xff]  }
 0x5dc   :  { %3136 = vmatprep.subr.bf16.mxu1 %v3982_v15 }
 0x5de   :  { %3125 = vmatpush3.bf16.msra.mxu0 %v4111_v60  ;;  %v1831_v60 = vrot.slane %v1817_v58, %v3757_v41  ;;  %v2670_v58 = vld [vmem:[%s4580_s4] ss:$0 sm:$0xff] }
 0x5df   :  { %3126 = vmatprep.subr.bf16.mxu0 %v4117_v61  ;;  %v1824_v61 = vrot.slane %v2664_v57, %v3757_v41 }
 0x5e0   :  { %1870 = vmatprep.mubr.bf16.mxu0 %v1831_v60  ;;  %v1833_v8 = vcombine.high %v1831_v60, %v1831_v60 }
 0x5e1   :  { %v1832_v62 = vcombine.high %v1824_v61, %v1824_v61 }
 0x5e2   :  { %3127 = vmatpush3.bf16.msra.mxu0 %v4218_v1 }
 0x5e3   :  { %3128 = vmatprep.subr.bf16.mxu0 %v4224_v56 }
 0x5e6   :  { %3129 = vmatpush3.bf16.msra.mxu0 %v4230_v63 }
 0x5e7   :  { %3303 = vmatprep.subr.bf16.mxu0 %v3500_v51 }
 0x5e9   :  { %1871 = vmatmul.mubr.bf16.vlgmr.msra.gmra.mxu0 %v1824_v61 }
 0x5ea   :  { %3311 = vmatprep.mubr.msk.bf16.mxu0 %vm3501_vm0, %v3500_v51 }
 0x669   :  { %v1611_v1 = vpop.f32.mrf.mxu0 }
 0x66a   :  { %v1617_v56 = vadd.f32 %v1611_v1, %v4318_v16 }
 0x66b   :  { %v3289_v63 = vpop.f32.mrf.mxu0 }
 0x66d   :  { %v1614_v29 = vpop.f32.mrf.mxu0 }
 0x66f   :  { %v3290_v15 = vpop.f32.mrf.mxu0 }
 0x670   :  { %v3414_v15 = vld [vmem:[%s4583_s7 + $0x38] sm:$0xff]  }
 0x689   :  { %v3103_v34 = vpop.f32.mrf.mxu0 }
 0x68b   :  { %v3104_v31 = vpop.f32.mrf.mxu0 }
 0x68c   :  { %v3105_v0 = vadd.f32 %v3104_v31, %v3103_v34  ;;  %v3415_v34 = vld [vmem:[%s4583_s7 + $0xb8] sm:$0xff]  }
 0x68d   :  { %v3106_v3 = vpop.f32.mrf.mxu0 }
 0x68e   :  { %v1724_v4 = vadd.f32 %v3105_v0, %v1684_v35  ;;  %v3416_v35 = vld [vmem:[%s4583_s7 + $0x70] sm:$0xff]  }
 0x68f   :  { %v3107_v6 = vpop.f32.mrf.mxu0  ;;  %v3417_v0 = vld [vmem:[%s4583_s7 + $0xf0] sm:$0xff]  }
 0x690   :  { %v1729_v41 = vmax.f32 %v1724_v4, 0.0  ;;  %v3418_v3 = vld [vmem:[%s4583_s7 + $0x30] sm:$0xff]   ;;  %v3420_v6 = vld [vmem:[%s4583_s7 + $0x68] sm:$0xff]  }
 0x691   :  { %v3419_v4 = vld [vmem:[%s4583_s7 + $0xb0] sm:$0xff]  }
 0x692   :  { %v1730_v9 = vpack.c.bf16 %v1729_v41, %v1729_v41  ;;  %v3421_v41 = vld [vmem:[%s4583_s7 + $0xe8] sm:$0xff]  }
 0x694   :  { %3300 = vmatmul.mubr.msk.bf16.vlgmr.msra.gmra.mxu1 %vm562_vm1, %v1730_v9  ;;  %v3423_v9 = vld [vmem:[%s4583_s7 + $0xa8] sm:$0xff]  }
 0x695   :  { %3137 = vmatpush3.bf16.msra.mxu1 %v4000_v47  ;;  %1910 = vmatprep.mubr.bf16.mxu1 %v1833_v8  ;;  %v3384_v47 = vld [vmem:[%s4579_s3 + $0x118] sm:$0xff]   ;;  %v3422_v8 = vld [vmem:[%s4583_s7 + $0x28] sm:$0xff]  }
 0x696   :  { %3138 = vmatprep.subr.bf16.mxu1 %v4006_v48  ;;  %3304 = vmatpush3.bf16.msra.mxu0 %v3384_v47  ;;  %v3425_v47 = vld [vmem:[%s4583_s7 + $0xe0] sm:$0xff]  }
 0x697   :  { %3305 = vmatprep.subr.bf16.mxu0 %v3500_v51 }
 0x699   :  { %3139 = vmatpush3.bf16.msra.mxu1 %v4012_v49 }
 0x69a   :  { %3140 = vmatprep.subr.bf16.mxu1 %v4018_v50 }
 0x69d   :  { %3141 = vmatpush3.bf16.msra.mxu1 %v4024_v52 }
 0x69e   :  { %3142 = vmatprep.subr.bf16.mxu1 %v4030_v53 }
 0x6a1   :  { %3143 = vmatpush3.bf16.msra.mxu1 %v4036_v54  ;;  %v3385_v54 = vld [vmem:[%s4579_s3 + $0x110] sm:$0xff]  }
 0x6a2   :  { %3144 = vmatprep.subr.bf16.mxu1 %v4042_v55  ;;  %3306 = vmatpush3.bf16.msra.mxu0 %v3385_v54  ;;  %v3386_v55 = vld [vmem:[%s4579_s3 + $0x108] sm:$0xff]   ;;  %v3431_v54 = vld [vmem:[%s4583_s7 + $0x98] sm:$0xff]  }
 0x6a3   :  { %3307 = vmatprep.subr.bf16.mxu0 %v3500_v51 }
 0x6a5   :  { %3145 = vmatpush3.bf16.msra.mxu1 %v4163_v24  ;;  %v3387_v24 = vld [vmem:[%s4579_s3 + $0x100] sm:$0xff]  }
 0x6a6   :  { %3146 = vmatprep.subr.bf16.mxu1 %v4169_v39  ;;  %3308 = vmatpush3.bf16.msra.mxu0 %v3386_v55  ;;  %v3388_v39 = vld [vmem:[%s4581_s5 + $0x60] ss:$16 sps:$4 sm:$0xff]  }
 0x6a7   :  { %3309 = vmatprep.subr.bf16.mxu0 %v3500_v51  ;;  %v3396_v51 = vld [vmem:[%s4581_s5 + $0x44] ss:$16 sps:$4 sm:$0xff]  }
 0x6a8   :  { %v3432_v55 = vld [vmem:[%s4583_s7 + $0x50] sm:$0xff]  }
 0x6a9   :  { %3147 = vmatpush3.bf16.msra.mxu1 %v4175_v40  ;;  %v3130_v48 = vpop.f32.mrf.mxu0  ;;  %v3390_v40 = vld [vmem:[%s4581_s5 + $0x64] ss:$16 sps:$4 sm:$0xff]  }
 0x6aa   :  { %3148 = vmatprep.subr.bf16.mxu1 %v4181_v42  ;;  %3310 = vmatpush3.bf16.msra.mxu0 %v3387_v24  ;;  %v3393_v42 = vld [vmem:[%s4581_s5 + $0x6c] ss:$16 sps:$4 sm:$0xff]   ;;  %v3433_v24 = vld [vmem:[%s4583_s7 + $0xd0] sm:$0xff]  }
 0x6ab   :  { %v3131_v49 = vpop.f32.mrf.mxu0  ;;  %2176 = vmatprep.subr.bf16.mxu0 %v3393_v42  ;;  %v3436_v42 = vld [vmem:[%s4583_s7 + $0x48] sm:$0xff]  }
 0x6ac   :  { %v3132_v50 = vadd.f32 %v3131_v49, %v3130_v48  ;;  %v3426_v48 = vld [vmem:[%s4583_s7 + $0x20] sm:$0xff]  }
 0x6ad   :  { %3149 = vmatpush3.bf16.msra.mxu1 %v4187_v43  ;;  %v3133_v52 = vpop.f32.mrf.mxu0  ;;  %v3394_v43 = vld [vmem:[%s4581_s5 + $0x40] ss:$16 sps:$4 sm:$0xff]  }
 0x6ae   :  { %3150 = vmatprep.subr.bf16.mxu1 %v4193_v44  ;;  %v1873_v20 = vadd.f32 %v3476_v18, %v3132_v50  ;;  %v3427_v49 = vld [vmem:[%s4583_s7 + $0xa0] sm:$0xff]   ;;  %v3428_v50 = vld [vmem:[%s4583_s7 + $0x58] sm:$0xff]  }
 0x6af   :  { %v3134_v53 = vpop.f32.mrf.mxu0  ;;  %v3429_v52 = vld [vmem:[%s4583_s7 + $0xd8] sm:$0xff]   ;;  %v2022_v18 = vld [vmem:[%s4582_s6] sm:$0xf] }
 0x6b0   :  { %v3430_v53 = vld [vmem:[%s4583_s7 + $0x18] sm:$0xff]  }
 0x6b1   :  { %3151 = vmatpush3.bf16.msra.mxu1 %v4199_v46 }
 0x6b2   :  { %2135 = vmatprep.subr.bf16.mxu1 %v3390_v40  ;;  %v3435_v40 = vld [vmem:[%s4583_s7 + $0x90] sm:$0xff]  }
 0x6b4   :  { %1911 = vmatmul.mubr.bf16.vlgmr.msra.gmra.mxu1 %v1832_v62  ;;  %v3424_v62 = vld [vmem:[%s4583_s7 + $0x60] sm:$0xff]  }
 0x6b5   :  { %2136 = vmatpush1.bf16.msra.mxu1 %v3388_v39  ;;  %2159 = vmatprep.mubr.bf16.mxu1 %v3502_v27  ;;  %v3434_v39 = vld [vmem:[%s4583_s7 + $0x10] sm:$0xff]  }
 0x6b6   :  { %2137 = vmatprep.subr.bf16.mxu1 %v3396_v51  ;;  %v3437_v51 = vld [vmem:[%s4583_s7 + $0xc8] sm:$0xff]  }
 0x6b9   :  { %2138 = vmatpush1.bf16.msra.mxu1 %v3394_v43  ;;  %v3438_v43 = vld [vmem:[%s4583_s7 + $0x8] sm:$0xff]  }
 0x6ba   :  { %2139 = vmatprep.subr.bf16.mxu1 %v3402_v26 }
 0x6bd   :  { %2140 = vmatpush1.bf16.msra.mxu1 %v3400_v5 }
 0x6be   :  { %2141 = vmatprep.subr.bf16.mxu1 %v3408_v19 }
 0x6c1   :  { %2142 = vmatpush1.bf16.msra.mxu1 %v3406_v23 }
 0x6c2   :  { %3163 = vmatprep.subr.bf16.mxu1 %v3412_v30 }
 0x754   :  { %v1800_v44 = vpop.f32.mrf.mxu1 }
 0x755   :  { %v1806_v46 = vadd.f32 %v1800_v44, %v1617_v56  ;;  %v3439_v44 = vld [vmem:[%s4583_s7 + $0x88] sm:$0xff]  }
 0x756   :  { %v3301_v10 = vpop.f32.mrf.mxu1 }
 0x757   :  { %v3441_v10 = vld [vmem:[%s4583_s7 + $0xc0] sm:$0xff]  }
 0x758   :  { %v1803_v12 = vpop.f32.mrf.mxu1 }
 0x759   :  { %v3442_v12 = vld [vmem:[%s4583_s7] sm:$0xff]  }
 0x75a   :  { %v3302_v14 = vpop.f32.mrf.mxu1 }
 0x75b   :  { %v3443_v14 = vld [vmem:[%s4583_s7 + $0x80] sm:$0xff]  }
 0x774   :  { %v3152_v16 = vpop.f32.mrf.mxu1 }
 0x776   :  { %v3153_v17 = vpop.f32.mrf.mxu1 }
 0x777   :  { %v3154_v22 = vadd.f32 %v3153_v17, %v3152_v16  ;;  %v2026_v16 = vsub.s32 0, %v3744_v33  ;;  %v2034_v17 = vsub.s32 2, %v3744_v33 }
 0x778   :  { %v3155_v2 = vpop.f32.mrf.mxu1 }
 0x779   :  { %v1913_v59 = vadd.f32 %v3154_v22, %v1873_v20  ;;  %v2030_v20 = vsub.s32 1, %v3744_v33  ;;  %v2038_v22 = vsub.s32 3, %v3744_v33  ;;  %v2027_v2 = vrot.slane %v2022_v18, %v2026_v16 }
 0x77a   :  { %v3156_v36 = vpop.f32.mrf.mxu1 }
 0x77b   :  { %v1918_v37 = vmax.f32 %v1913_v59, 0.0  ;;  %v2035_v59 = vrot.slane %v2022_v18, %v2034_v17  ;;  %v2031_v36 = vrot.slane %v2022_v18, %v2030_v20 }
 0x77d   :  { %v1919_v45 = vpack.c.bf16 %v1918_v37, %v1918_v37  ;;  %v2039_v37 = vrot.slane %v2022_v18, %v2038_v22 }
 0x77f   :  { %3312 = vmatmul.mubr.msk.bf16.vlgmr.msra.gmra.mxu0 %vm562_vm1, %v1919_v45 }
 0x780   :  { %2177 = vmatpush1.bf16.msra.mxu0 %v3391_v38  ;;  %2200 = vmatprep.mubr.bf16.mxu0 %v3502_v27 }
 0x781   :  { %2178 = vmatprep.subr.bf16.mxu0 %v3399_v28 }
 0x784   :  { %2179 = vmatpush1.bf16.msra.mxu0 %v3397_v11 }
 0x785   :  { %2180 = vmatprep.subr.bf16.mxu0 %v3405_v13 }
 0x788   :  { %2181 = vmatpush1.bf16.msra.mxu0 %v3403_v7 }
 0x789   :  { %2182 = vmatprep.subr.bf16.mxu0 %v3411_v21 }
 0x78c   :  { %2183 = vmatpush1.bf16.msra.mxu0 %v3409_v25 }
 0x78d   :  { %3185 = vmatprep.subr.bf16.mxu0 %v3413_v32 }
 0x83f   :  { %v1989_v57 = vpop.f32.mrf.mxu0 }
 0x840   :  { %v1995_v60 = vadd.f32 %v1989_v57, %v1806_v46  ;;  %v3440_v46 = vld [vmem:[%s4583_s7 + $0x40] sm:$0xff]  }
 0x841   :  { %v3313_v61 = vpop.f32.mrf.mxu0 }
 0x842   :  { %v2003_v1 = vadd.f32 %v2670_v58, %v1995_v60 }
 0x843   :  { %v1992_v56 = vpop.f32.mrf.mxu0 }
 0x844   :  { %v2004_v63 = vmax.f32 %v2003_v1, 0.0 }
 0x845   :  { %v3314_v29 = vpop.f32.mrf.mxu0 }
 0x846   :  { %v2005_v31 = vpack.c.bf16 %v2004_v63, %v2004_v63  ;;  %v2689_v63 = vld [vmem:[%s4584_s8] ss:$0 sm:$0xff] }
 0x848   :  { %2687 = vmatmul.mubr.msk.bf16.vlgmr.msra.gmra.mxu1 %vm562_vm1, %v2005_v31  ;;  %2688 = vmatmul.mubr.msk.bf16.vlgmr.msra.gmra.mxu0 %vm562_vm1, %v2005_v31 }
 0x849   :  { %3164 = vmatpush3.bf16.msra.mxu1 %v3414_v15  ;;  %3186 = vmatpush3.bf16.msra.mxu0 %v3415_v34 }
 0x84a   :  { %3165 = vmatprep.subr.bf16.mxu1 %v3416_v35  ;;  %3187 = vmatprep.subr.bf16.mxu0 %v3417_v0 }
 0x84d   :  { %3166 = vmatpush3.bf16.msra.mxu1 %v3418_v3  ;;  %3188 = vmatpush3.bf16.msra.mxu0 %v3419_v4 }
 0x84e   :  { %3167 = vmatprep.subr.bf16.mxu1 %v3420_v6  ;;  %3189 = vmatprep.subr.bf16.mxu0 %v3421_v41 }
 0x851   :  { %3168 = vmatpush3.bf16.msra.mxu1 %v3422_v8  ;;  %3190 = vmatpush3.bf16.msra.mxu0 %v3423_v9 }
 0x852   :  { %3169 = vmatprep.subr.bf16.mxu1 %v3424_v62  ;;  %3191 = vmatprep.subr.bf16.mxu0 %v3425_v47 }
 0x855   :  { %3170 = vmatpush3.bf16.msra.mxu1 %v3426_v48  ;;  %3192 = vmatpush3.bf16.msra.mxu0 %v3427_v49 }
 0x856   :  { %3171 = vmatprep.subr.bf16.mxu1 %v3428_v50  ;;  %3193 = vmatprep.subr.bf16.mxu0 %v3429_v52 }
 0x859   :  { %3172 = vmatpush3.bf16.msra.mxu1 %v3430_v53  ;;  %3194 = vmatpush3.bf16.msra.mxu0 %v3431_v54 }
 0x85a   :  { %3173 = vmatprep.subr.bf16.mxu1 %v3432_v55  ;;  %3195 = vmatprep.subr.bf16.mxu0 %v3433_v24 }
 0x85d   :  { %3174 = vmatpush3.bf16.msra.mxu1 %v3434_v39  ;;  %3196 = vmatpush3.bf16.msra.mxu0 %v3435_v40 }
 0x85e   :  { %3175 = vmatprep.subr.bf16.mxu1 %v3436_v42  ;;  %3197 = vmatprep.subr.bf16.mxu0 %v3437_v51 }
 0x861   :  { %3176 = vmatpush3.bf16.msra.mxu1 %v3438_v43  ;;  %3198 = vmatpush3.bf16.msra.mxu0 %v3439_v44 }
 0x862   :  { %3177 = vmatprep.subr.bf16.mxu1 %v3440_v46  ;;  %3199 = vmatprep.subr.bf16.mxu0 %v3441_v10 }
 0x865   :  { %3178 = vmatpush3.bf16.msra.mxu1 %v3442_v12  ;;  %3200 = vmatpush3.bf16.msra.mxu0 %v3443_v14 }
 0x908   :  { %v2161_v38 = vpop.f32.mrf.mxu1  ;;  %v2202_v45 = vpop.f32.mrf.mxu0 }
 0x909   :  { %v2162_v28 = vadd.f32 %v2161_v38, %v2027_v2  ;;  %v2203_v11 = vadd.f32 %v2202_v45, %v2035_v59 }
 0x90a   :  { %v2163_v26 = vpop.f32.mrf.mxu1  ;;  %v2204_v13 = vpop.f32.mrf.mxu0 }
 0x90b   :  { %v2164_v5 = vadd.f32 %v2163_v26, %v2031_v36  ;;  %v2205_v7 = vadd.f32 %v2204_v13, %v2039_v37  ;;  %v2209_v19 = vmax.f32 %v2162_v28, 0.0  ;;  %v2211_v21 = vmax.f32 %v2203_v11, 0.0 }
 0x90c   :  { %v2165_v23 = vpop.f32.mrf.mxu1  ;;  %v2206_v25 = vpop.f32.mrf.mxu0 }
 0x90d   :  { %v2210_v27 = vmax.f32 %v2164_v5, 0.0  ;;  %v2212_v30 = vmax.f32 %v2205_v7, 0.0  ;;  %v2213_v60 = vpack.c.bf16 %v2209_v19, %v2209_v19  ;;  %v2215_v61 = vpack.c.bf16 %v2211_v21, %v2211_v21 }
 0x90e   :  { %v2166_v32 = vpop.f32.mrf.mxu1  ;;  %v2207_v33 = vpop.f32.mrf.mxu0 }
 0x90f   :  { %v2214_v57 = vpack.c.bf16 %v2210_v27, %v2210_v27  ;;  %v2216_v58 = vpack.c.bf16 %v2212_v30, %v2212_v30 }
 0x911   :  { %2512 = vmatprep.mubr.bf16.mxu1 %v2214_v57  ;;  %2552 = vmatprep.mubr.bf16.mxu0 %v2216_v58 }
 0x912   :  { %2513 = vmatmul.mubr.bf16.vlgmr.msra.gmra.mxu1 %v2213_v60  ;;  %2553 = vmatmul.mubr.bf16.vlgmr.msra.gmra.mxu0 %v2215_v61 }
 0x9d2   :  { %v3179_v1 = vpop.f32.mrf.mxu1  ;;  %v3201_v56 = vpop.f32.mrf.mxu0 }
 0x9d4   :  { %v3180_v29 = vpop.f32.mrf.mxu1  ;;  %v3202_v15 = vpop.f32.mrf.mxu0 }
 0x9d5   :  { %v3181_v34 = vadd.f32 %v3180_v29, %v3179_v1  ;;  %v3203_v3 = vadd.f32 %v3202_v15, %v3201_v56 }
 0x9d6   :  { %v3182_v31 = vpop.f32.mrf.mxu1  ;;  %v3204_v35 = vpop.f32.mrf.mxu0 }
 0x9d7   :  { %v2515_v0 = vadd.f32 %v3181_v34, %v2689_v63 }
 0x9d8   :  { %v3183_v4 = vpop.f32.mrf.mxu1  ;;  %v3205_v6 = vpop.f32.mrf.mxu0 }
 0x9d9   :  { %v2555_v41 = vadd.f32 %v3203_v3, %v2515_v0 }
 0x9db   :  { %2560 = vst [vmem:[#allocation2] sm:$0x3] %v2555_v41 }
 0x9dc   :  { %3488 = shalt.err (!%p3485_p4)
}
 0x9dd   :  { %2570 = dma.vmem_to_hbm [thread:$0]  %s2568_s13, 32, %s4585_s9, [#allocation3]  }
 0x9de   :  { %3497 = dma.done.wait [#allocation3], 32  }
 0x9df   :  { %3498 = vsyncadd [#allocation3], 4294967264 }
 0x9e0   :  { %2574 = vsyncpa [#allocation3], 1 }

</bundles_post_ra>
